<compile_context>
chip_gen: v5e
topology: v5e:2x2
jax: 0.10.0
libtpu: 0.0.40
codegen_flags: <defaults>
</compile_context>

<pallas_src>
import jax
import jax.numpy as jnp
from jax.experimental import pallas as pl
from jax.experimental.pallas import tpu as pltpu


def _ffm_kernel(f1_ref, f2_ref, w_ref, b_ref, o_ref):
    # f1_ref, f2_ref, o_ref: (Bb, C, TS) f32 (channels on sublanes, spatial on lanes)
    # w_ref:                 (C, C) f32 fused weight (BN scale folded into conv_1 W)
    # b_ref:                 (C, 1) f32 fused bias = 2 * (scale*conv_b + shift)
    w = w_ref[...]
    b = b_ref[...]
    for bi in range(o_ref.shape[0]):          # static unroll over the batch block
        xsum = f1_ref[bi] + f2_ref[bi]        # VPU add, f32
        acc = jnp.dot(w, xsum,
                      precision=jax.lax.Precision.HIGHEST,
                      preferred_element_type=jnp.float32)   # MXU, full f32
        o_ref[bi] = (acc + b).astype(o_ref.dtype)


def _vmem_capacity_bytes():
    try:
        return int(pltpu.get_tpu_info().vmem_capacity_bytes)
    except Exception:
        return 64 * 1024 * 1024    # conservative fallback (v7x per-core VMEM)


def _choose_tiling(B, C, S, vmem_cap):
    """Pick (Bb, TS): batch block and 128-multiple spatial tile.

    Per-grid-step, double-buffered working set (f32):
      streams : (2 inputs + 1 output) * Bb * C * TS * 4 B * 2 buffers
      weight  : C * C * 4 B * 2 buffers   (constant index; budgeted anyway)
    """
    budget = max(int(0.45 * vmem_cap), 4 << 20)        # leave pipelining headroom
    stream_budget = max(budget - 2 * C * C * 4, 1 << 20)

    def stream_bytes(bb, ts):
        return 2 * 3 * bb * C * ts * 4

    s_padded = -(-S // 128) * 128
    ts_cap = max(128, (stream_budget // (2 * 3 * C * 4)) // 128 * 128)
    TS = int(min(2048, ts_cap, s_padded))
    n_s = -(-S // TS)

    Bb = 1
    if n_s == 1:
        # Small feature maps: pack batches per step to enlarge DMAs, but keep
        # the grid >= 2 steps so both v7x TensorCores get work.
        while (Bb * 2 <= B and B % (Bb * 2) == 0
               and Bb * TS < 1024
               and stream_bytes(Bb * 2, TS) <= stream_budget
               and B // (Bb * 2) >= 2):
            Bb *= 2
    return Bb, TS


def ffm_forward(feat_1, feat_2, conv_w, conv_b,
                bn_gamma, bn_beta, bn_mean, bn_var, eps=1e-5):
    """FFM.forward with eval-mode BatchNorm.

    feat_1, feat_2 : [B, C, H, W] float32
    conv_w         : [C, C, 1, 1]  (conv_1 weight; conv_2 is unused in forward)
    conv_b         : [C]
    bn_*           : [C] BatchNorm2d affine params / running statistics
    returns        : [B, C, H, W] float32
    """
    B, C, H, W = feat_1.shape
    S = H * W

    vmem_cap = _vmem_capacity_bytes()
    Bb, TS = _choose_tiling(B, C, S, vmem_cap)

    # ---- fold eval-mode BN into the 1x1 conv (both branches share conv_1+bn) ----
    # bn(conv(x)) = scale * (W x + b) + shift,  scale = gamma / sqrt(var+eps)
    scale = bn_gamma / jnp.sqrt(bn_var + eps)                 # [C]
    shift = bn_beta - bn_mean * scale                         # [C]
    w_fused = conv_w.reshape(C, C) * scale[:, None]           # [Cout, Cin] f32
    # bn(conv(f1)) + bn(conv(f2)) = W'(f1 + f2) + 2*b'  (linearity)
    bias2 = (2.0 * (scale * conv_b + shift)).reshape(C, 1)    # [C, 1] f32

    # NCHW -> [B, C, S] is a pure reshape (spatial already fastest-varying).
    f1 = feat_1.reshape(B, C, S)
    f2 = feat_2.reshape(B, C, S)

    grid = (pl.cdiv(B, Bb), pl.cdiv(S, TS))

    # Raise the VMEM limit to the actual working set (scoped defaults of
    # 16/32 MiB would otherwise cap large tiles / pipelining depth).
    needed = (2 * 3 * Bb * C * TS * 4        # streamed blocks, double-buffered
              + 2 * C * C * 4                # fused weight
              + 2 * C * 128 * 4              # fused bias (lane-padded)
              + (2 << 20))                   # headroom
    vmem_limit = int(min(vmem_cap, max(needed, 32 << 20)))

    cost = pl.CostEstimate(
        flops=2 * B * C * C * S + 2 * B * C * S,
        transcendentals=0,
        bytes_accessed=3 * B * C * S * 4 + C * C * 4 + C * 4,
    )

    out = pl.pallas_call(
        _ffm_kernel,
        out_shape=jax.ShapeDtypeStruct((B, C, S), jnp.float32),
        grid_spec=pltpu.PrefetchScalarGridSpec(
            num_scalar_prefetch=0,
            grid=grid,
            in_specs=[
                pl.BlockSpec((Bb, C, TS), lambda b, s: (b, 0, s)),
                pl.BlockSpec((Bb, C, TS), lambda b, s: (b, 0, s)),
                # Constant-index operands (weight / bias); tiny at C=128.
                # TODO(synk): for very large C on v7x (64 MiB VMEM), stage the
                # weight once into a VMEM scratch instead of a (possibly
                # double-buffered) BlockSpec operand.
                pl.BlockSpec((C, C), lambda b, s: (0, 0)),
                pl.BlockSpec((C, 1), lambda b, s: (0, 0)),
            ],
            out_specs=pl.BlockSpec((Bb, C, TS), lambda b, s: (b, 0, s)),
        ),
        compiler_params=pltpu.CompilerParams(
            dimension_semantics=("parallel", "parallel"),
            vmem_limit_bytes=vmem_limit),
        cost_estimate=cost,
    )(f1, f2, w_fused, bias2)

    return out.reshape(B, C, H, W)


if __name__ == "__main__":
    # Small, MXU/lane-friendly demo config: B=2, C=128, 16x16 spatial.
    B, C, H, W = 2, 128, 16, 16

    key = jax.random.PRNGKey(0)
    k1, k2, kw, kb, kg, kbe, km, kv = jax.random.split(key, 8)

    feat_1 = jax.random.normal(k1, (B, C, H, W), dtype=jnp.float32)
    feat_2 = jax.random.normal(k2, (B, C, H, W), dtype=jnp.float32)
    conv_w = jax.random.normal(kw, (C, C, 1, 1), dtype=jnp.float32) * 0.02
    conv_b = jax.random.normal(kb, (C,), dtype=jnp.float32) * 0.02
    bn_gamma = 1.0 + 0.1 * jax.random.normal(kg, (C,), dtype=jnp.float32)
    bn_beta = 0.1 * jax.random.normal(kbe, (C,), dtype=jnp.float32)
    bn_mean = 0.1 * jax.random.normal(km, (C,), dtype=jnp.float32)
    bn_var = jax.random.uniform(kv, (C,), dtype=jnp.float32,
                                minval=0.5, maxval=1.5)

    out = ffm_forward(feat_1, feat_2, conv_w, conv_b,
                      bn_gamma, bn_beta, bn_mean, bn_var)
    jax.block_until_ready(out)

    # Plain-JAX f32 reference: 1x1 conv + eval-mode BN per branch, then sum.
    def ref_branch(x):
        y = jax.lax.conv_general_dilated(
            x, conv_w, window_strides=(1, 1), padding="VALID",
            dimension_numbers=("NCHW", "OIHW", "NCHW"),
            precision=jax.lax.Precision.HIGHEST)
        y = y + conv_b[None, :, None, None]
        s = bn_gamma / jnp.sqrt(bn_var + 1e-5)
        sh = bn_beta - bn_mean * s
        return y * s[None, :, None, None] + sh[None, :, None, None]

    ref = ref_branch(feat_1) + ref_branch(feat_2)

    assert out.shape == (B, C, H, W)
    assert jnp.allclose(out, ref, atol=5e-3, rtol=5e-3), \
        float(jnp.max(jnp.abs(out - ref)))

    print("KERNEL_OK")
</pallas_src>

<mosaic_0001>
module attributes {stable_mosaic.version = 11 : i64} {
  func.func @_ffm_kernel(%arg0: i32, %arg1: i32, %arg2: memref<1x128x256xf32, #tpu.memory_space<vmem>>, %arg3: memref<1x128x256xf32, #tpu.memory_space<vmem>>, %arg4: memref<128x128xf32, #tpu.memory_space<vmem>>, %arg5: memref<128x1xf32, #tpu.memory_space<vmem>>, %arg6: memref<1x128x256xf32, #tpu.memory_space<vmem>>) attributes {dimension_semantics = [#tpu.dimension_semantics<parallel>, #tpu.dimension_semantics<parallel>], iteration_bounds = array<i64: 2, 1>, scalar_prefetch = 0 : i64, scratch_operands = 0 : i64, tpu.core_type = #tpu.core_type<tc>, window_params = [{transform_indices = @transform_0, window_bounds = array<i64: 1, 128, 256>}, {transform_indices = @transform_1, window_bounds = array<i64: 1, 128, 256>}, {pipeline_mode = #tpu.pipeline_mode<synchronous>, transform_indices = @transform_2, window_bounds = array<i64: 128, 128>}, {pipeline_mode = #tpu.pipeline_mode<synchronous>, transform_indices = @transform_3, window_bounds = array<i64: 128, 1>}, {transform_indices = @transform_4, window_bounds = array<i64: 1, 128, 256>}]} {
    %c0 = arith.constant 0 : index
    %c0_0 = arith.constant 0 : index
    %0 = vector.load %arg4[%c0, %c0_0] : memref<128x128xf32, #tpu.memory_space<vmem>>, vector<128x128xf32>
    %c0_1 = arith.constant 0 : index
    %c0_2 = arith.constant 0 : index
    %1 = vector.load %arg5[%c0_1, %c0_2] : memref<128x1xf32, #tpu.memory_space<vmem>>, vector<128x1xf32>
    %c0_3 = arith.constant 0 : index
    %c0_4 = arith.constant 0 : index
    %c0_5 = arith.constant 0 : index
    %2 = vector.load %arg2[%c0_3, %c0_4, %c0_5] : memref<1x128x256xf32, #tpu.memory_space<vmem>>, vector<1x128x256xf32>
    %3 = vector.shape_cast %2 : vector<1x128x256xf32> to vector<128x256xf32>
    %c0_6 = arith.constant 0 : index
    %c0_7 = arith.constant 0 : index
    %c0_8 = arith.constant 0 : index
    %4 = vector.load %arg3[%c0_6, %c0_7, %c0_8] : memref<1x128x256xf32, #tpu.memory_space<vmem>>, vector<1x128x256xf32>
    %5 = vector.shape_cast %4 : vector<1x128x256xf32> to vector<128x256xf32>
    %6 = arith.addf %3, %5 : vector<128x256xf32>
    %cst = arith.constant dense<0.000000e+00> : vector<128x256xf32>
    %7 = tpu.matmul %0, %6, %cst {dimension_numbers = #tpu.dot_dimension_numbers<[1], [0], [0], [1], [0, 0, 1, 1], [], []>, precision = #tpu.contract_precision<fp32>} : vector<128x128xf32>, vector<128x256xf32>, vector<128x256xf32> -> vector<128x256xf32>
    %8 = vector.broadcast %1 : vector<128x1xf32> to vector<128x256xf32>
    %9 = arith.addf %7, %8 : vector<128x256xf32>
    %c0_9 = arith.constant 0 : index
    %c0_10 = arith.constant 0 : index
    %c0_11 = arith.constant 0 : index
    %10 = vector.load %arg6[%c0_9, %c0_10, %c0_11] : memref<1x128x256xf32, #tpu.memory_space<vmem>>, vector<1x128x256xf32>
    %11 = vector.shape_cast %10 : vector<1x128x256xf32> to vector<128x256xf32>
    %12 = vector.shape_cast %9 : vector<128x256xf32> to vector<1x128x256xf32>
    tpu.vector_store %arg6[%c0_9, %c0_10, %c0_11], %12 {strides = array<i32>} : memref<1x128x256xf32, #tpu.memory_space<vmem>>, vector<1x128x256xf32>,
    return
  }
  func.func @transform_0(%arg0: i32, %arg1: i32) -> (i32, i32, i32) {
    %c0_i32 = arith.constant 0 : i32
    %c0_i32_0 = arith.constant 0 : i32
    return %arg0, %c0_i32, %arg1 : i32, i32, i32
  }
  func.func @transform_1(%arg0: i32, %arg1: i32) -> (i32, i32, i32) {
    %c0_i32 = arith.constant 0 : i32
    %c0_i32_0 = arith.constant 0 : i32
    return %arg0, %c0_i32, %arg1 : i32, i32, i32
  }
  func.func @transform_2(%arg0: i32, %arg1: i32) -> (i32, i32) {
    %c0_i32 = arith.constant 0 : i32
    %c0_i32_0 = arith.constant 0 : i32
    %c0_i32_1 = arith.constant 0 : i32
    return %c0_i32, %c0_i32_0 : i32, i32
  }
  func.func @transform_3(%arg0: i32, %arg1: i32) -> (i32, i32) {
    %c0_i32 = arith.constant 0 : i32
    %c0_i32_0 = arith.constant 0 : i32
    %c0_i32_1 = arith.constant 0 : i32
    return %c0_i32, %c0_i32_0 : i32, i32
  }
  func.func @transform_4(%arg0: i32, %arg1: i32) -> (i32, i32, i32) {
    %c0_i32 = arith.constant 0 : i32
    %c0_i32_0 = arith.constant 0 : i32
    return %arg0, %c0_i32, %arg1 : i32, i32, i32
  }
}

</mosaic_0001>

<bundles_post_ra>
// kernel: tpu_custom_call.1
= control target key start
LH: loop header
LB: loop body
LE: loop exit
PB: predicated region body
PF: predicated region fallthrough
CT: control target
= control target key end

     0   :  { %s3912_s0 = inlined_call_operand.hbm [shape: f32[2,128,256], index: 0, kind: input, shape index: {}]   ;;  %s3913_s1 = inlined_call_operand.hbm [shape: f32[2,128,256], index: 1, kind: input, shape index: {}]   ;;  %s3914_s2 = inlined_call_operand.vmem [shape: f32[128,128], index: 2, kind: input, shape index: {}]   ;;  %s3915_s3 = inlined_call_operand.vmem [shape: f32[128,1], index: 3, kind: input, shape index: {}]   ;;  %s3916_s4 = inlined_call_operand.hbm [shape: f32[2,128,256], index: 4, kind: output, shape index: {}]  }
   0x1   :  { %3990 = sst [smem:[#allocation49_spill]] %s3912_s0 }
   0x2   :  { %9 = vsyncpa [#allocation3], 0 }
   0x3   :  { %11 = vsyncpa [#allocation3 + $0x1], 0 }
   0x4   :  { %12 = vsyncpa [#allocation6], 0 }
   0x5   :  { %14 = vsyncpa [#allocation6 + $0x1], 0 }
   0x6   :  { %15 = vsyncpa [#allocation4], 0 }
   0x7   :  { %17 = vsyncpa [#allocation4 + $0x1], 0  ;;  %s2543_s15 = smov 0   ;;  %s2545_s16 = smov 0  }
   0x8   :  { %s2547_s17 = smov 0   ;;  %s2549_s18 = smov 0  }
   0x9   :  { %s2551_s19 = smov 0   ;;  %s2553_s20 = smov 0  }
   0xa LB: > { %s2268_s21 = sadd.s32 4294967295, %s2511_s20   ;;  %s2269_s22 = sadd.s32 4294967294, %s2511_s20   ;;  %s2511_s20 = sphi %s2553_s20, %s23_s20   ;;  %s2507_s19 = sphi %s2551_s19, %s4114_s19   ;;  %s2503_s18 = sphi %s2549_s18, %s4113_s18   ;;  %s2499_s17 = sphi %s2547_s17, %s4112_s17   ;;  %s2495_s16 = sphi %s2545_s16, %s4111_s16   ;;  %s2491_s15 = sphi %s2543_s15, %s4110_s15  }
   0xb   : > { %s35_s23 = sadd.s32 1, %s2507_s19  ;;  %s44_s24 = sadd.s32 1, %s2499_s17 }
   0xc   : > { %p37_p0 = scmp.ge.s32.totalorder %s35_s23, 2  ;;  %p51_p1 = scmp.ne.s32.totalorder %s2499_s17, %s2495_s16 }
   0xd   : > { %p52_p2 = scmp.eq.s32.totalorder %s2511_s20, 0  ;;  %p57_p3 = scmp.ne.s32.totalorder %s2495_s16, %s2491_s15 }
   0xe   : > { %s4116_s23 = smov (%p37_p0, %s35_s23), 0  ;;  %p58_p5 = scmp.eq.s32.totalorder %s2268_s21, 0 }
   0xf   : > { %3991 = sst [smem:[#allocation11_spill]] %s4116_s23  ;;  %p2584_p4 = por %p52_p2, %p51_p1 }
  0x10   : > { %s39_s26 = ssub.s32 %s2507_s19, %s4116_s23  ;;  %p153_p6 = scmp.eq.s32.totalorder %s2268_s21, 1 }
  0x11   : > { %p42_p7 = scmp.eq.s32.totalorder %s39_s26, 0  ;;  %p2590_p8 = por %p58_p5, %p57_p3 }
  0x12   : > { %p2594_p9 = por %p153_p6, %p51_p1  ;;  %p159_p10 = scmp.eq.s32.totalorder %s2269_s22, 1 }
  0x13   : > { %s2599_s29 = scalar_select %p42_p7, %s2499_s17, %s44_s24  }
  0x14   : > { %p2601_p11 = por %p159_p10, %p57_p3  ;;  %p2271_p12 = scmp.ge.s32.totalorder %s2511_s20, 2 }
  0x15   : > { %p2307_p13 = scmp.lt.s32.totalorder %s2511_s20, 2  ;;  %s2608_s5 = sand.u32 1, %s2499_s17  }
  0x16   : > { %s2272_s6 = sshll.u32 %s2608_s5, 8  ;;  %s2287_s7 = sshll.u32 %s2507_s19, 8 }
  0x17   : > { %s3996_s0 = sld [smem:[#allocation49_spill]]  ;;  %s189_s11 = scalar_lea.vmem [#allocation2], %s2272_s6 }
  0x18   : > { %s199_s12 = sshll.u32 %s189_s11, 4  ;;  %p2617_p0 = pnand %p2307_p13, %p2584_p4  ;;  %s200_s12 = int_to_ptr.vmem [resolvable:$true] %s199_s12 }
  0x19   : > { %p2278_p1 = scmp.ge.s32.totalorder %s2511_s20, 1  ;;  %s186_s21 = scalar_lea.sflag [#allocation3], %s2608_s5 }
  0x1a   : > { %s2513_s22 = smov 256   ;;  %s2514_s24 = smov 16  }
  0x1b   : > { %p231_p2 = scmp.lt.s32.totalorder %s2511_s20, 3  ;;  %s220_s9 = scalar_lea.hbm %s3913_s1, %s2287_s7 }
  0x1c   : > { %s213_s25 = scalar_lea.vmem [#allocation5], %s2272_s6 }
  0x1d   : > { %s196_s10 = scalar_lea.hbm %s3996_s0, %s2287_s7  ;;  %p232_p3 = pnand %p2278_p1, %p231_p2 }
  0x1e   : > { %s197_s13 = sshll.u32 %s196_s10, 4  ;;  %s221_s10 = sshll.u32 %s220_s9, 4  ;;  %s198_s13 = int_to_ptr.hbm [resolvable:$true] %s197_s13  ;;  %s222_s10 = int_to_ptr.hbm [resolvable:$true] %s221_s10 }
  0x1f   : > { %2299 = dma.hbm_to_vmem [thread:$0]  (!%p2617_p0), %s198_s13, 4096, %s200_s12, %s186_s21, %s2513_s22, %s2513_s22, %s2514_s24  }
  0x20   : > { %s223_s11 = sshll.u32 %s213_s25, 4  ;;  %s210_s0 = scalar_lea.sflag [#allocation6], %s2608_s5  ;;  %s224_s11 = int_to_ptr.vmem [resolvable:$true] %s223_s11 }
  0x21   : > { %2302 = dma.hbm_to_vmem [thread:$0]  (!%p2617_p0), %s222_s10, 4096, %s224_s11, %s210_s0, %s2513_s22, %s2513_s22, %s2514_s24  }
  0x22   : > { %235 = sbr.rel (%p232_p3) target bundleno = 603 (0x25b), region = 36 }
  0x27   : > { %s2633_s23 = sand.u32 1, %s2495_s16  }
  0x28   : > { %s2636_s12 = sshll.u32 %s2633_s23, 8  ;;  %s238_s7 = scalar_lea.sflag [#allocation3], %s2633_s23 }
  0x29   : > { %s2640_s13 = scalar_lea.vmem [#allocation2], %s2636_s12 }
  0x2a   : > { %2478 = dma.done.wait (%p2590_p8), %s238_s7, 4096  }
  0x2b   : > { %2480 = vsyncadd (%p2590_p8), %s238_s7, 4294963200  ;;  %s248_s0 = scalar_lea.sflag [#allocation6], %s2633_s23  ;;  %s2648_s5 = scalar_lea.vmem [#allocation5], %s2636_s12 }
  0x2c   : > { %2482 = dma.done.wait (%p2590_p8), %s248_s0, 4096  }
  0x2d   : > { %2484 = vsyncadd (%p2590_p8), %s248_s0, 4294963200  ;;  %v347_v0 = vld [vmem:[%s2640_s13 + $0xf0] sm:$0xff]  ;;  %v345_v2 = vld [vmem:[%s2640_s13 + $0xe0] sm:$0xff]  ;;  %s3700_s26 = scalar_lea.vmem [#allocation7], %s2636_s12  ;;  %s2289_s12 = sshll.u32 %s2503_s18, 8 }
  0x2e   : > { %v379_v1 = vld [vmem:[%s2648_s5 + $0xf0] sm:$0xff]  ;;  %v377_v4 = vld [vmem:[%s2648_s5 + $0xe0] sm:$0xff]  ;;  %s2151_s10 = scalar_lea.hbm %s3916_s4, %s2289_s12  ;;  %s2152_s25 = sshll.u32 %s3700_s26, 4  ;;  %s2153_s25 = int_to_ptr.vmem [resolvable:$true] %s2152_s25 }
  0x2f   : > { %v411_v3 = vadd.f32 %v379_v1, %v347_v0  ;;  %v343_v5 = vld [vmem:[%s2640_s13 + $0xd0] sm:$0xff]  ;;  %v409_v7 = vadd.f32 %v377_v4, %v345_v2  ;;  %v341_v9 = vld [vmem:[%s2640_s13 + $0xc0] sm:$0xff]  ;;  %s2154_s11 = sshll.u32 %s2151_s10, 4  ;;  %s2138_s18 = scalar_lea.sflag [#allocation4], %s2633_s23  ;;  %s2155_s11 = int_to_ptr.hbm [resolvable:$true] %s2154_s11 }
  0x30   : > { %v375_v6 = vld [vmem:[%s2648_s5 + $0xd0] sm:$0xff]  ;;  %v373_v10 = vld [vmem:[%s2648_s5 + $0xc0] sm:$0xff]  ;;  %s2439_s7 = sshra.s32 %s2155_s11, 4  ;;  %s2445_s27 = scalar_lea.hbm %s3916_s4, 512  ;;  %s2440_s7 = int_to_ptr.hbm [resolvable:$true] %s2439_s7 }
  0x31   : > { %v407_v8 = vadd.f32 %v375_v6, %v343_v5  ;;  %v339_v11 = vld [vmem:[%s2640_s13 + $0xb0] sm:$0xff]  ;;  %v2663_v12 = vand.u32 4294901760, %v411_v3  ;;  %v405_v13 = vadd.f32 %v373_v10, %v341_v9  ;;  %v337_v15 = vld [vmem:[%s2640_s13 + $0xa0] sm:$0xff]  ;;  %v2668_v17 = vand.u32 4294901760, %v409_v7  ;;  %s2441_s0 = scalar_lea.hbm %s2440_s7, 256  ;;  %p2446_p7 = scmp.lt.s32.totalorder %s2440_s7, %s3916_s4 }
  0x32   : > { %v371_v14 = vld [vmem:[%s2648_s5 + $0xb0] sm:$0xff]  ;;  %v369_v16 = vld [vmem:[%s2648_s5 + $0xa0] sm:$0xff]  ;;  %p2442_p4 = scmp.ne.s32.totalorder %s2440_s7, %s2441_s0  ;;  %p2447_p8 = scmp.lt.s32.totalorder %s2445_s27, %s2441_s0 }
  0x33   : > { %v2670_v18 = vand.u32 4294901760, %v407_v8  ;;  %v403_v19 = vadd.f32 %v371_v14, %v339_v11  ;;  %v401_v20 = vadd.f32 %v369_v16, %v337_v15  ;;  %v335_v21 = vld [vmem:[%s2640_s13 + $0x90] sm:$0xff]  ;;  %v333_v23 = vld [vmem:[%s2640_s13 + $0x80] sm:$0xff]  ;;  %494 = vmatpush.msra.mxu0 %v2663_v12  ;;  %v2677_v24 = vsub.f32 %v411_v3, %v2663_v12  ;;  %945 = vmatpush.msra.mxu3 %v2663_v12 }
  0x34   : > { %v367_v22 = vld [vmem:[%s2648_s5 + $0x90] sm:$0xff]  ;;  %v2679_v25 = vand.u32 4294901760, %v405_v13  ;;  %v365_v27 = vld [vmem:[%s2648_s5 + $0x80] sm:$0xff]  ;;  %v2684_v28 = vsub.f32 %v409_v7, %v2668_v17  ;;  %p2443_p5 = pnand %p2442_p4, %p2594_p9  ;;  %p2448_p10 = por %p2447_p8, %p2446_p7 }
  0x35   : > { %v399_v26 = vadd.f32 %v367_v22, %v335_v21  ;;  %v2686_v29 = vand.u32 4294901760, %v403_v19  ;;  %v2689_v30 = vsub.f32 %v407_v8, %v2670_v18  ;;  %v2691_v31 = vand.u32 4294901760, %v401_v20  ;;  %v331_v32 = vld [vmem:[%s2640_s13 + $0x70] sm:$0xff]  ;;  %496 = vmatpush.msra.mxu0 %v2668_v17  ;;  %817 = vmatpush.msra.mxu2 %v2677_v24  ;;  %v329_v42 = vld [vmem:[%s2640_s13 + $0x60] sm:$0xff] }
  0x36   : > { %v363_v33 = vld [vmem:[%s2648_s5 + $0x70] sm:$0xff]  ;;  %v656_v34 = vand.u32 4294901760, %v2677_v24  ;;  %v2699_v35 = vsub.f32 %v405_v13, %v2679_v25  ;;  %v397_v37 = vadd.f32 %v365_v27, %v333_v23  ;;  %947 = vmatpush.msra.mxu3 %v2668_v17  ;;  %v3934_v38 = vand.u32 4294901760, %v2684_v28  ;;  %v361_v43 = vld [vmem:[%s2648_s5 + $0x60] sm:$0xff]  ;;  %p2444_p6 = pneg %p2443_p5 }
  0x37   : > { %v2701_v36 = vand.u32 4294901760, %v399_v26  ;;  %v3933_v39 = vand.u32 4294901760, %v2689_v30  ;;  %v2707_v40 = vsub.f32 %v403_v19, %v2686_v29  ;;  %v2710_v41 = vsub.f32 %v401_v20, %v2691_v31  ;;  %498 = vmatpush.msra.mxu0 %v2670_v18  ;;  %820 = vmatpush.msra.mxu2 %v2684_v28  ;;  %v327_v52 = vld [vmem:[%s2640_s13 + $0x50] sm:$0xff]  ;;  %v325_v61 = vld [vmem:[%s2640_s13 + $0x40] sm:$0xff] }
  0x38   : > { %v657_v44 = vsub.f32 %v2677_v24, %v656_v34  ;;  %v2719_v45 = vand.u32 4294901760, %v397_v37  ;;  %v3928_v46 = vand.u32 4294901760, %v2699_v35  ;;  %v395_v47 = vadd.f32 %v363_v33, %v331_v32  ;;  %949 = vmatpush.msra.mxu3 %v2670_v18  ;;  %v359_v53 = vld [vmem:[%s2648_s5 + $0x50] sm:$0xff]  ;;  %v357_v62 = vld [vmem:[%s2648_s5 + $0x40] sm:$0xff]  ;;  %p2449_p13 = pnand %p2448_p10, %p2444_p6 }
  0x39   : > { %v663_v48 = vsub.f32 %v2684_v28, %v3934_v38  ;;  %v669_v49 = vsub.f32 %v2689_v30, %v3933_v39  ;;  %v3926_v50 = vand.u32 4294901760, %v2707_v40  ;;  %v2731_v51 = vsub.f32 %v399_v26, %v2701_v36  ;;  %500 = vmatpush.msra.mxu0 %v2679_v25  ;;  %823 = vmatpush.msra.mxu2 %v2689_v30  ;;  %v323_v3 = vld [vmem:[%s2640_s13 + $0x30] sm:$0xff]  ;;  %v321_v9 = vld [vmem:[%s2640_s13 + $0x20] sm:$0xff]  ;;  %v288_v39 = vld [vmem:[%s3914_s2 + $0x18] sm:$0xff] }
  0x3a   : > { %v658_v54 = vand.u32 4294901760, %v657_v44  ;;  %v675_v55 = vsub.f32 %v2699_v35, %v3928_v46  ;;  %v2740_v56 = vand.u32 4294901760, %v395_v47  ;;  %v393_v57 = vadd.f32 %v361_v43, %v329_v42  ;;  %951 = vmatpush.msra.mxu3 %v2679_v25  ;;  %v355_v4 = vld [vmem:[%s2648_s5 + $0x30] sm:$0xff]  ;;  %v353_v10 = vld [vmem:[%s2648_s5 + $0x20] sm:$0xff]  ;;  %v372_v38 = vld [vmem:[%s2648_s5 + $0xb8] sm:$0xff] }
  0x3b   : > { %v664_v58 = vand.u32 4294901760, %v663_v48  ;;  %v670_v59 = vand.u32 4294901760, %v669_v49  ;;  %v3925_v60 = vand.u32 4294901760, %v2710_v41  ;;  %502 = vmatpush.msra.mxu0 %v2686_v29  ;;  %v681_v63 = vsub.f32 %v2707_v40, %v3926_v50  ;;  %826 = vmatpush.msra.mxu2 %v2699_v35  ;;  %v319_v21 = vld [vmem:[%s2640_s13 + $0x10] sm:$0xff]  ;;  %v317_v43 = vld [vmem:[%s2640_s13] sm:$0xff] }
  0x3c   : > { %659 = vmatpush.msra.mxu1 %v658_v54  ;;  %v2750_v0 = vand.u32 4294901760, %v393_v57  ;;  %v2753_v1 = vsub.f32 %v397_v37, %v2719_v45  ;;  %v391_v2 = vadd.f32 %v359_v53, %v327_v52  ;;  %v676_v5 = vand.u32 4294901760, %v675_v55  ;;  %953 = vmatpush.msra.mxu3 %v2686_v29  ;;  %v351_v22 = vld [vmem:[%s2648_s5 + $0x10] sm:$0xff]  ;;  %v349_v44 = vld [vmem:[%s2648_s5] sm:$0xff] }
  0x3d   : > { %v687_v6 = vsub.f32 %v2710_v41, %v3925_v60  ;;  %v3924_v7 = vand.u32 4294901760, %v2731_v51  ;;  %v2764_v8 = vsub.f32 %v395_v47, %v2740_v56  ;;  %504 = vmatpush.msra.mxu0 %v2691_v31  ;;  %v389_v13 = vadd.f32 %v357_v62, %v325_v61  ;;  %829 = vmatpush.msra.mxu2 %v2707_v40  ;;  %v285_v53 = vld [vmem:[%s3914_s2] sm:$0xff]  ;;  %v348_v62 = vld [vmem:[%s2640_s13 + $0xf8] sm:$0xff]  ;;  %v374_v60 = vld [vmem:[%s2648_s5 + $0xc8] sm:$0xff] }
  0x3e   : > { %665 = vmatpush.msra.mxu1 %v664_v58  ;;  %v2769_v11 = vand.u32 4294901760, %v391_v2  ;;  %v3922_v14 = vand.u32 4294901760, %v2753_v1  ;;  %v2773_v15 = vsub.f32 %v393_v57, %v2750_v0  ;;  %955 = vmatpush.msra.mxu3 %v2691_v31  ;;  %v387_v19 = vadd.f32 %v355_v4, %v323_v3 }
  0x3f   : > { %v693_v16 = vsub.f32 %v2731_v51, %v3924_v7  ;;  %v3921_v20 = vand.u32 4294901760, %v2764_v8  ;;  %506 = vmatpush.msra.mxu0 %v2701_v36  ;;  %v682_v23 = vand.u32 4294901760, %v681_v63  ;;  %v2784_v26 = vand.u32 4294901760, %v389_v13  ;;  %832 = vmatpush.msra.mxu2 %v2710_v41  ;;  %v380_v63 = vld [vmem:[%s2648_s5 + $0xf8] sm:$0xff] }
  0x40   : > { %671 = vmatpush.msra.mxu1 %v670_v59  ;;  %v2787_v27 = vsub.f32 %v391_v2, %v2769_v11  ;;  %v385_v32 = vadd.f32 %v353_v10, %v321_v9  ;;  %v688_v33 = vand.u32 4294901760, %v687_v6  ;;  %957 = vmatpush.msra.mxu3 %v2701_v36  ;;  %v699_v37 = vsub.f32 %v2753_v1, %v3922_v14  ;;  %v286_v10 = vld [vmem:[%s3914_s2 + $0x8] sm:$0xff] }
  0x41   : > { %v2794_v42 = vand.u32 4294901760, %v387_v19  ;;  %508 = vmatpush.msra.mxu0 %v2719_v45  ;;  %v3920_v48 = vand.u32 4294901760, %v2773_v15  ;;  %v2803_v49 = vsub.f32 %v389_v13, %v2784_v26  ;;  %v383_v52 = vadd.f32 %v351_v22, %v319_v21  ;;  %835 = vmatpush.msra.mxu2 %v2731_v51  ;;  %v378_v21 = vld [vmem:[%s2648_s5 + $0xe8] sm:$0xff] }
  0x42   : > { %677 = vmatpush.msra.mxu1 %v676_v5  ;;  %v2799_v47 = vand.u32 4294901760, %v385_v32  ;;  %v694_v54 = vand.u32 4294901760, %v693_v16  ;;  %959 = vmatpush.msra.mxu3 %v2719_v45  ;;  %v705_v55 = vsub.f32 %v2764_v8, %v3921_v20  ;;  %v3918_v58 = vand.u32 4294901760, %v2787_v27 }
  0x43   : > { %510 = vmatpush.msra.mxu0 %v2740_v56  ;;  %v2814_v57 = vand.u32 4294901760, %v383_v52  ;;  %v2818_v59 = vsub.f32 %v387_v19, %v2794_v42  ;;  %v381_v61 = vadd.f32 %v349_v44, %v317_v43  ;;  %838 = vmatpush.msra.mxu2 %v2753_v1  ;;  %v3919_v2 = vand.u32 4294901760, %v2803_v49  ;;  %v346_v19 = vld [vmem:[%s2640_s13 + $0xe8] sm:$0xff] }
  0x44   : > { %683 = vmatpush.msra.mxu1 %v682_v23  ;;  %961 = vmatpush.msra.mxu3 %v2740_v56  ;;  %v2825_v3 = vand.u32 4294901760, %v285_v53  ;;  %v700_v4 = vand.u32 4294901760, %v699_v37  ;;  %v711_v5 = vsub.f32 %v2773_v15, %v3920_v48  ;;  %v2834_v9 = vsub.f32 %v385_v32, %v2799_v47 }
  0x45   : > { %512 = vmatpush.msra.mxu0 %v2750_v0  ;;  %v2831_v6 = vand.u32 4294901760, %v381_v61  ;;  %841 = vmatpush.msra.mxu2 %v2764_v8  ;;  %v412_v16 = vadd.f32 %v380_v63, %v348_v62  ;;  %v706_v22 = vand.u32 4294901760, %v705_v55  ;;  %v717_v23 = vsub.f32 %v2787_v27, %v3918_v58  ;;  %v344_v63 = vld [vmem:[%s2640_s13 + $0xd8] sm:$0xff] }
  0x46   : > { %689 = vmatpush.msra.mxu1 %v688_v33  ;;  %963 = vmatpush.msra.mxu3 %v2750_v0  ;;  %v2842_v13 = vsub.f32 %v285_v53, %v2825_v3  ;;  %v3923_v32 = vand.u32 4294901760, %v2818_v59  ;;  %v2852_v33 = vsub.f32 %v383_v52, %v2814_v57  ;;  %v723_v37 = vsub.f32 %v2803_v49, %v3919_v2  ;;  %v376_v58 = vld [vmem:[%s2648_s5 + $0xd8] sm:$0xff] }
  0x47   : > { %514 = vmatpush.msra.mxu0 %v2769_v11  ;;  %844 = vmatpush.msra.mxu2 %v2773_v15  ;;  %v2862_v44 = vand.u32 4294901760, %v412_v16  ;;  %v2864_v53 = vand.u32 4294901760, %v286_v10  ;;  %v712_v52 = vand.u32 4294901760, %v711_v5  ;;  %v2869_v55 = vsub.f32 %v381_v61, %v2831_v6  ;;  %v287_v61 = vld [vmem:[%s3914_s2 + $0x10] sm:$0xff] }
  0x48   : > { %3998 = vst [vmem:[#allocation12_spill] sm:$0xff] %v2842_v13  ;;  %695 = vmatpush.msra.mxu1 %v694_v54  ;;  %965 = vmatpush.msra.mxu3 %v2769_v11  ;;  %v2860_v43 = vand.u32 4294901760, %v2842_v13  ;;  %v3927_v54 = vand.u32 4294901760, %v2834_v9  ;;  %v410_v62 = vadd.f32 %v378_v21, %v346_v19  ;;  %v718_v5 = vand.u32 4294901760, %v717_v23 }
  0x49   : > { %516 = vmatpush.msra.mxu0 %v2784_v26  ;;  %847 = vmatpush.msra.mxu2 %v2787_v27  ;;  %v2878_v48 = vsub.f32 %v412_v16, %v2862_v44  ;;  %v729_v19 = vsub.f32 %v2818_v59, %v3923_v32  ;;  %v3930_v16 = vand.u32 4294901760, %v2852_v33  ;;  %v408_v14 = vadd.f32 %v376_v58, %v344_v63 }
  0x4a   : > { %3999 = vst [vmem:[#allocation13_spill] sm:$0xff] %v2860_v43  ;;  %701 = vmatpush.msra.mxu1 %v700_v4  ;;  %967 = vmatpush.msra.mxu3 %v2784_v26  ;;  %v528_v2 = vsub.f32 %v2842_v13, %v2860_v43  ;;  %v2881_v4 = vsub.f32 %v286_v10, %v2864_v53  ;;  %v2891_v21 = vand.u32 4294901760, %v410_v62  ;;  %v724_v10 = vand.u32 4294901760, %v723_v37  ;;  %v342_v37 = vld [vmem:[%s2640_s13 + $0xc8] sm:$0xff] }
  0x4b   : > { %518 = vmatpush.msra.mxu0 %v2794_v42  ;;  %850 = vmatpush.msra.mxu2 %v2803_v49  ;;  %v3929_v20 = vand.u32 4294901760, %v2878_v48  ;;  %v3932_v23 = vand.u32 4294901760, %v2869_v55  ;;  %v2904_v7 = vand.u32 4294901760, %v287_v61  ;;  %v406_v63 = vadd.f32 %v374_v60, %v342_v37 }
  0x4c   : > { %4000 = vst [vmem:[#allocation14_spill] sm:$0xff] %v2881_v4  ;;  %707 = vmatpush.msra.mxu1 %v706_v22  ;;  %969 = vmatpush.msra.mxu3 %v2794_v42  ;;  %v735_v22 = vsub.f32 %v2834_v9, %v3927_v54  ;;  %v2902_v32 = vsub.f32 %v410_v62, %v2891_v21  ;;  %v2909_v50 = vand.u32 4294901760, %v528_v2  ;;  %v2913_v58 = vand.u32 4294901760, %v2881_v4 }
  0x4d   : > { %520 = vmatpush.msra.mxu0 %v2799_v47  ;;  %853 = vmatpush.msra.mxu2 %v2818_v59  ;;  %v730_v62 = vand.u32 4294901760, %v729_v19  ;;  %v741_v54 = vsub.f32 %v2852_v33, %v3930_v16  ;;  %v1463_v2 = vsub.f32 %v2878_v48, %v3929_v20  ;;  %v2930_v37 = vand.u32 4294901760, %v406_v63 }
  0x4e   : > { %713 = vmatpush.msra.mxu1 %v712_v52  ;;  %971 = vmatpush.msra.mxu3 %v2799_v47  ;;  %4001 = vst [vmem:[#allocation15_spill] sm:$0xff] %v2913_v58  ;;  %v2915_v52 = vand.u32 4294901760, %v408_v14  ;;  %v3931_v46 = vand.u32 4294901760, %v2902_v32  ;;  %v747_v19 = vsub.f32 %v2869_v55, %v3932_v23  ;;  %v2944_v16 = vsub.f32 %v287_v61, %v2904_v7 }
  0x4f   : > { %522 = vmatpush.msra.mxu0 %v2814_v57  ;;  %856 = vmatpush.msra.mxu2 %v2834_v9 }
  0x50   : > { %719 = vmatpush.msra.mxu1 %v718_v5  ;;  %973 = vmatpush.msra.mxu3 %v2814_v57  ;;  %v2928_v60 = vsub.f32 %v408_v14, %v2915_v52  ;;  %v736_v5 = vand.u32 4294901760, %v735_v22  ;;  %v1469_v20 = vsub.f32 %v2902_v32, %v3931_v46  ;;  %v536_v14 = vsub.f32 %v2881_v4, %v2913_v58 }
  0x51   : > { %524 = vmatpush.msra.mxu0 %v2831_v6  ;;  %859 = vmatpush.msra.mxu2 %v2852_v33  ;;  %4002 = vst [vmem:[#allocation16_spill] sm:$0xff] %v2944_v16  ;;  %v742_v22 = vand.u32 4294901760, %v741_v54  ;;  %v1464_v46 = vand.u32 4294901760, %v1463_v2  ;;  %v748_v61 = vand.u32 4294901760, %v747_v19  ;;  %v2966_v23 = vand.u32 4294901760, %v2944_v16 }
  0x52   : > { %725 = vmatpush.msra.mxu1 %v724_v10  ;;  %530 = vmatmul.f32.vlgmr.msra.gmra.mxu0 %v2909_v50  ;;  %v2947_v10 = vsub.f32 %v406_v63, %v2930_v37  ;;  %v1470_v63 = vand.u32 4294901760, %v1469_v20  ;;  %v2963_v2 = vand.u32 4294901760, %v536_v14  ;;  %v4004_v20 = vand.u32 4294901760, %v2928_v60 }
  0x53   : > { %975 = vmatpush.msra.mxu3 %v2831_v6  ;;  %862 = vmatpush.msra.mxu2 %v2869_v55  ;;  %4003 = vst [vmem:[#allocation17_spill] sm:$0xff] %v2966_v23  ;;  %v4005_v54 = vand.u32 4294901760, %v2684_v28  ;;  %v544_v28 = vsub.f32 %v2944_v16, %v2966_v23 }
  0x54   : > { %731 = vmatpush.msra.mxu1 %v730_v62  ;;  %979 = vmatmul.f32.vlgmr.msra.gmra.mxu3 %v2860_v43  ;;  %v340_v62 = vld [vmem:[%s2640_s13 + $0xb8] sm:$0xff]  ;;  %v2968_v43 = vand.u32 4294901760, %v288_v39  ;;  %v1475_v19 = vsub.f32 %v2928_v60, %v4004_v20 }
  0x55   : > { %865 = vmatmul.f32.vlgmr.msra.gmra.mxu2 %v2842_v13  ;;  %1076 = vmatpush.msrb.mxu0 %v656_v34  ;;  %v301_v34 = vld [vmem:[%s3915_s3] sm:$0xff]  ;;  %v3006_v13 = vand.u32 4294901760, %v544_v28 }
  0x56   : > { %737 = vmatpush.msra.mxu1 %v736_v5  ;;  %1300 = vmatpush.msrb.mxu2 %v2862_v44  ;;  %v404_v5 = vadd.f32 %v372_v38, %v340_v62  ;;  %v4006_v38 = vand.u32 4294901760, %v2947_v10  ;;  %v2989_v14 = vsub.f32 %v288_v39, %v2968_v43 }
  0x57   : > { %1465 = vmatpush.msrb.mxu3 %v1464_v46  ;;  %1080 = vmatpush.msrb.mxu0 %v4005_v54  ;;  %v1476_v54 = vand.u32 4294901760, %v1475_v19 }
  0x58   : > { %743 = vmatpush.msra.mxu1 %v742_v22  ;;  %1302 = vmatpush.msrb.mxu2 %v2891_v21  ;;  %v2976_v24 = vand.u32 4294901760, %v404_v5  ;;  %v1481_v46 = vsub.f32 %v2947_v10, %v4006_v38  ;;  %4007 = vst [vmem:[#allocation18_spill] sm:$0xff] %v2989_v14  ;;  %v289_v22 = vld [vmem:[%s3914_s2 + $0x20] sm:$0xff]  ;;  %v338_v38 = vld [vmem:[%s2640_s13 + $0xa8] sm:$0xff]  ;;  %v3012_v19 = vand.u32 4294901760, %v2989_v14 }
  0x59   : > { %1471 = vmatpush.msrb.mxu3 %v1470_v63  ;;  %v2515_v63 = vmov 0   ;;  %v3002_v20 = vand.u32 4294901760, %v289_v22 }
  0x5a   : > { %749 = vmatpush.msra.mxu1 %v748_v61  ;;  %538 = vmatmul.f32.gmra.mxu0 %v2963_v2  ;;  %v2995_v61 = vsub.f32 %v404_v5, %v2976_v24  ;;  %v1482_v39 = vand.u32 4294901760, %v1481_v46  ;;  %v370_v5 = vld [vmem:[%s2648_s5 + $0xa8] sm:$0xff]  ;;  %4009 = vst [vmem:[#allocation19_spill] sm:$0xff] %v3012_v19  ;;  %v4010_v46 = vand.u32 4294901760, %v2699_v35 }
  0x5b   : > { %751 = vmatmul.f32.vlgmr.msra.gmra.mxu1 %v2825_v3  ;;  %2362 = vset.pattern.permute.xlu0 %v2515_v63  ;;  %v3034_v35 = vsub.f32 %v289_v22, %v3002_v20  ;;  %v4012_v22 = vand.u32 4294901760, %v2707_v40  ;;  %v4014_v40 = vand.u32 4294901760, %v2710_v41 }
  0x5c   : > { %1203 = vmatpush.msrb.mxu1 %v2663_v12  ;;  %985 = vmatmul.f32.gmra.mxu3 %v2913_v58  ;;  %v3937_v62 = vand.u32 4294901760, %v2995_v61  ;;  %v4008_v12 = vand.u32 4294901760, %v2689_v30  ;;  %v303_v30 = vld [vmem:[%s3915_s3 + $0x10] sm:$0xff] }
  0x5d   : > { %415 = vperm.xlu0 %2362, %v301_v34   ;;  %870 = vmatmul.f32.gmra.mxu2 %v2881_v4  ;;  %4011 = vst [vmem:[#allocation20_spill] sm:$0xff] %v3034_v35 }
  0x5e   : > { %1205 = vmatpush.msrb.mxu1 %v2668_v17  ;;  %1304 = vmatpush.msrb.mxu2 %v2915_v52  ;;  %v1487_v34 = vsub.f32 %v2995_v61, %v3937_v62  ;;  %v402_v17 = vadd.f32 %v370_v5, %v338_v38  ;;  %v290_v38 = vld [vmem:[%s3914_s2 + $0x28] sm:$0xff]  ;;  %v368_v62 = vld [vmem:[%s2648_s5 + $0x98] sm:$0xff] }
  0x5f   : > { %1084 = vmatpush.msrb.mxu0 %v4008_v12  ;;  %1477 = vmatpush.msrb.mxu3 %v1476_v54  ;;  %v302_v12 = vld [vmem:[%s3915_s3 + $0x8] sm:$0xff] }
  0x60   : > { %1207 = vmatpush.msrb.mxu1 %v2670_v18  ;;  %1306 = vmatpush.msrb.mxu2 %v2930_v37  ;;  %v3024_v28 = vand.u32 4294901760, %v402_v17  ;;  %v552_v18 = vsub.f32 %v2989_v14, %v3012_v19  ;;  %v1488_v54 = vand.u32 4294901760, %v1487_v34  ;;  %v3048_v34 = vand.u32 4294901760, %v290_v38 }
  0x61   : > { %1088 = vmatpush.msrb.mxu0 %v4010_v46  ;;  %1483 = vmatpush.msrb.mxu3 %v1482_v39  ;;  %v336_v46 = vld [vmem:[%s2640_s13 + $0x98] sm:$0xff] }
  0x62   : > { %2363 = vset.pattern.permute.xlu1 %v2515_v63  ;;  %546 = vmatmul.f32.gmra.mxu0 %v3006_v13  ;;  %v3040_v39 = vsub.f32 %v402_v17, %v3024_v28  ;;  %v3052_v58 = vand.u32 4294901760, %v552_v18  ;;  %v3055_v17 = vand.u32 4294901760, %v3034_v35 }
  0x63   : > { %755 = vmatmul.f32.gmra.mxu1 %v2864_v53  ;;  %425 = vperm.xlu1 %2363, %v303_v30   ;;  %v400_v30 = vadd.f32 %v368_v62, %v336_v46  ;;  %v366_v46 = vld [vmem:[%s2648_s5 + $0x88] sm:$0xff] }
  0x64   : > { %1209 = vmatpush.msrb.mxu1 %v2679_v25  ;;  %991 = vmatmul.f32.gmra.mxu3 %v2966_v23  ;;  %v3939_v5 = vand.u32 4294901760, %v3040_v39  ;;  %4013 = vst [vmem:[#allocation21_spill] sm:$0xff] %v3055_v17  ;;  %v560_v41 = vsub.f32 %v3034_v35, %v3055_v17  ;;  %v354_v23 = vld [vmem:[%s2648_s5 + $0x28] sm:$0xff] }
  0x65   : > { %420 = vperm.xlu0 %2362, %v302_v12   ;;  %875 = vmatmul.f32.gmra.mxu2 %v2944_v16  ;;  %v304_v12 = vld [vmem:[%s3915_s3 + $0x18] sm:$0xff] }
  0x66   : > { %1092 = vmatpush.msrb.mxu0 %v4012_v22  ;;  %1308 = vmatpush.msrb.mxu2 %v2976_v24  ;;  %v1493_v25 = vsub.f32 %v3040_v39, %v3939_v5  ;;  %v3068_v22 = vand.u32 4294901760, %v400_v30 }
  0x67   : > { %1489 = vmatpush.msrb.mxu3 %v1488_v54  ;;  %1211 = vmatpush.msrb.mxu1 %v2686_v29  ;;  %v3071_v54 = vsub.f32 %v290_v38, %v3048_v34  ;;  %v4016_v29 = vand.u32 4294901760, %v2731_v51  ;;  %v334_v38 = vld [vmem:[%s2640_s13 + $0x88] sm:$0xff] }
  0x68   : > { %1096 = vmatpush.msrb.mxu0 %v4014_v40  ;;  %1310 = vmatpush.msrb.mxu2 %v3024_v28  ;;  %v1494_v18 = vand.u32 4294901760, %v1493_v25  ;;  %v3081_v62 = vsub.f32 %v400_v30, %v3068_v22  ;;  %v3096_v25 = vand.u32 4294901760, %v560_v41 }
  0x69   : > { %2364 = vset.pattern.permute.xlu2 %v2515_v63  ;;  %4015 = vst [vmem:[#allocation22_spill] sm:$0xff] %v3071_v54  ;;  %1213 = vmatpush.msrb.mxu1 %v2691_v31  ;;  %v291_v31 = vld [vmem:[%s3914_s2 + $0x30] sm:$0xff]  ;;  %v3091_v63 = vand.u32 4294901760, %v3071_v54 }
  0x6a   : > { %1100 = vmatpush.msrb.mxu0 %v4016_v29  ;;  %1495 = vmatpush.msrb.mxu3 %v1494_v18  ;;  %v3940_v51 = vand.u32 4294901760, %v3081_v62  ;;  %v3098_v30 = vand.u32 4294901760, %v291_v31  ;;  %v4018_v18 = vand.u32 4294901760, %v2753_v1 }
  0x6b   : > { %554 = vmatmul.f32.gmra.mxu0 %v3052_v58  ;;  %759 = vmatmul.f32.gmra.mxu1 %v2904_v7  ;;  %4017 = vst [vmem:[#allocation23_spill] sm:$0xff] %v3091_v63  ;;  %v568_v41 = vsub.f32 %v3071_v54, %v3091_v63 }
  0x6c   : > { %430 = vperm.xlu1 %2363, %v304_v12   ;;  %997 = vmatmul.f32.gmra.mxu3 %v3012_v19  ;;  %v1499_v40 = vsub.f32 %v3081_v62, %v3940_v51  ;;  %v398_v12 = vadd.f32 %v366_v46, %v334_v38  ;;  %v3116_v1 = vsub.f32 %v291_v31, %v3098_v30  ;;  %v292_v38 = vld [vmem:[%s3914_s2 + $0x38] sm:$0xff] }
  0x6d   : > { %1312 = vmatpush.msrb.mxu2 %v3068_v22  ;;  %1215 = vmatpush.msrb.mxu1 %v2701_v36  ;;  %v4019_v36 = vand.u32 4294901760, %v2764_v8  ;;  %v307_v8 = vld [vmem:[%s3915_s3 + $0x30] sm:$0xff]  ;;  %v3131_v31 = vand.u32 4294901760, %v568_v41  ;;  %v332_v46 = vld [vmem:[%s2640_s13 + $0x78] sm:$0xff]  ;;  %v4023_v41 = vand.u32 4294901760, %v2787_v27 }
  0x6e   : > { %880 = vmatmul.f32.gmra.mxu2 %v2989_v14  ;;  %1104 = vmatpush.msrb.mxu0 %v4018_v18  ;;  %v1500_v29 = vand.u32 4294901760, %v1499_v40  ;;  %v3106_v5 = vand.u32 4294901760, %v398_v12  ;;  %4020 = vst [vmem:[#allocation24_spill] sm:$0xff] %v3116_v1  ;;  %v364_v40 = vld [vmem:[%s2648_s5 + $0x78] sm:$0xff]  ;;  %v3138_v18 = vand.u32 4294901760, %v3116_v1 }
  0x6f   : > { %1217 = vmatpush.msrb.mxu1 %v2719_v45  ;;  %445 = vperm.xlu0 %2362, %v307_v8   ;;  %v396_v51 = vadd.f32 %v364_v40, %v332_v46  ;;  %v293_v46 = vld [vmem:[%s3914_s2 + $0x40] sm:$0xff]  ;;  %v308_v40 = vld [vmem:[%s3915_s3 + $0x38] sm:$0xff] }
  0x70   : > { %1108 = vmatpush.msrb.mxu0 %v4019_v36  ;;  %v3119_v45 = vsub.f32 %v398_v12, %v3106_v5  ;;  %1501 = vmatpush.msrb.mxu3 %v1500_v29  ;;  %v4021_v12 = vand.u32 4294901760, %v2773_v15  ;;  %4022 = vst [vmem:[#allocation25_spill] sm:$0xff] %v3138_v18  ;;  %v3140_v29 = vand.u32 4294901760, %v292_v38  ;;  %v4024_v15 = vand.u32 4294901760, %v2803_v49  ;;  %v305_v49 = vld [vmem:[%s3915_s3 + $0x20] sm:$0xff] }
  0x71   : > { %1219 = vmatpush.msrb.mxu1 %v2740_v56  ;;  %1314 = vmatpush.msrb.mxu2 %v3106_v5 }
  0x72   : > { %v3942_v56 = vand.u32 4294901760, %v3119_v45  ;;  %1112 = vmatpush.msrb.mxu0 %v4021_v12  ;;  %v3158_v27 = vsub.f32 %v292_v38, %v3140_v29  ;;  %435 = vperm.xlu2 %2364, %v305_v49   ;;  %v330_v12 = vld [vmem:[%s2640_s13 + $0x68] sm:$0xff]  ;;  %v4028_v49 = vand.u32 4294901760, %v2818_v59 }
  0x73   : > { %562 = vmatmul.f32.gmra.mxu0 %v3096_v25  ;;  %763 = vmatmul.f32.gmra.mxu1 %v2968_v43 }
  0x74   : > { %1003 = vmatmul.f32.gmra.mxu3 %v3055_v17  ;;  %v1505_v36 = vsub.f32 %v3119_v45, %v3942_v56  ;;  %1221 = vmatpush.msrb.mxu1 %v2750_v0  ;;  %v3148_v17 = vand.u32 4294901760, %v396_v51  ;;  %v576_v0 = vsub.f32 %v3116_v1, %v3138_v18  ;;  %4025 = vst [vmem:[#allocation26_spill] sm:$0xff] %v3158_v27 }
  0x75   : > { %1116 = vmatpush.msrb.mxu0 %v4023_v41  ;;  %450 = vperm.xlu1 %2363, %v308_v40  }
  0x76   : > { %885 = vmatmul.f32.gmra.mxu2 %v3034_v35  ;;  %v1506_v8 = vand.u32 4294901760, %v1505_v36  ;;  %1223 = vmatpush.msrb.mxu1 %v2769_v11  ;;  %v3164_v11 = vsub.f32 %v396_v51, %v3148_v17  ;;  %v3176_v51 = vand.u32 4294901760, %v293_v46  ;;  %v362_v36 = vld [vmem:[%s2648_s5 + $0x68] sm:$0xff]  ;;  %v3180_v41 = vand.u32 4294901760, %v576_v0 }
  0x77   : > { %1120 = vmatpush.msrb.mxu0 %v4024_v15  ;;  %1316 = vmatpush.msrb.mxu2 %v3148_v17  ;;  %v3183_v15 = vand.u32 4294901760, %v3158_v27  ;;  %v394_v56 = vadd.f32 %v362_v36, %v330_v12  ;;  %v4029_v0 = vand.u32 4294901760, %v2834_v9  ;;  %v294_v9 = vld [vmem:[%s3914_s2 + $0x48] sm:$0xff]  ;;  %v328_v12 = vld [vmem:[%s2640_s13 + $0x58] sm:$0xff] }
  0x78   : > { %1507 = vmatpush.msrb.mxu3 %v1506_v8  ;;  %v3945_v38 = vand.u32 4294901760, %v3164_v11  ;;  %4026 = vst [vmem:[#allocation27_spill] sm:$0xff] %v3176_v51  ;;  %1225 = vmatpush.msrb.mxu1 %v2784_v26  ;;  %v3197_v40 = vsub.f32 %v293_v46, %v3176_v51  ;;  %v360_v36 = vld [vmem:[%s2648_s5 + $0x58] sm:$0xff]  ;;  %v322_v35 = vld [vmem:[%s2640_s13 + $0x28] sm:$0xff] }
  0x79   : > { %4027 = vst [vmem:[#allocation28_spill] sm:$0xff] %v3183_v15  ;;  %1124 = vmatpush.msrb.mxu0 %v4028_v49  ;;  %v584_v26 = vsub.f32 %v3158_v27, %v3183_v15  ;;  %v386_v16 = vadd.f32 %v354_v23, %v322_v35 }
  0x7a   : > { %v1511_v8 = vsub.f32 %v3164_v11, %v3945_v38  ;;  %1227 = vmatpush.msrb.mxu1 %v2794_v42  ;;  %4030 = vst [vmem:[#allocation29_spill] sm:$0xff] %v3197_v40  ;;  %v306_v42 = vld [vmem:[%s3915_s3 + $0x28] sm:$0xff] }
  0x7b   : > { %570 = vmatmul.f32.gmra.mxu0 %v3131_v31  ;;  %767 = vmatmul.f32.gmra.mxu1 %v3002_v20 }
  0x7c   : > { %1009 = vmatmul.f32.gmra.mxu3 %v3091_v63  ;;  %v1512_v63 = vand.u32 4294901760, %v1511_v8  ;;  %1128 = vmatpush.msrb.mxu0 %v4029_v0  ;;  %v3224_v8 = vand.u32 4294901760, %v294_v9  ;;  %v392_v0 = vadd.f32 %v360_v36, %v328_v12  ;;  %v358_v12 = vld [vmem:[%s2648_s5 + $0x48] sm:$0xff] }
  0x7d   : > { %440 = vperm.xlu2 %2364, %v306_v42   ;;  %1229 = vmatpush.msrb.mxu1 %v2799_v47  ;;  %v4034_v42 = vand.u32 4294901760, %v2852_v33 }
  0x7e   : > { %890 = vmatmul.f32.gmra.mxu2 %v3071_v54  ;;  %v3191_v54 = vand.u32 4294901760, %v394_v56  ;;  %1513 = vmatpush.msrb.mxu3 %v1512_v63  ;;  %v3222_v63 = vand.u32 4294901760, %v584_v26  ;;  %4033 = vst [vmem:[#allocation32_spill] sm:$0xff] %v3224_v8 }
  0x7f   : > { %1132 = vmatpush.msrb.mxu0 %v4034_v42  ;;  %1231 = vmatpush.msrb.mxu1 %v2814_v57  ;;  %v3243_v57 = vsub.f32 %v294_v9, %v3224_v8  ;;  %v326_v9 = vld [vmem:[%s2640_s13 + $0x48] sm:$0xff] }
  0x80   : > { %v3204_v59 = vsub.f32 %v394_v56, %v3191_v54  ;;  %1318 = vmatpush.msrb.mxu2 %v3191_v54  ;;  %v3217_v56 = vand.u32 4294901760, %v3197_v40  ;;  %4032 = vst [vmem:[#allocation31_spill] sm:$0xff] %v3222_v63 }
  0x81   : > { %1233 = vmatpush.msrb.mxu1 %v2831_v6  ;;  %4036 = vst [vmem:[#allocation33_spill] sm:$0xff] %v3243_v57  ;;  %v295_v6 = vld [vmem:[%s3914_s2 + $0x50] sm:$0xff] }
  0x82   : > { %v3949_v46 = vand.u32 4294901760, %v3204_v59  ;;  %4031 = vst [vmem:[#allocation30_spill] sm:$0xff] %v3217_v56  ;;  %v592_v47 = vsub.f32 %v3197_v40, %v3217_v56  ;;  %v3266_v36 = vand.u32 4294901760, %v295_v6 }
  0x83   : > { %578 = vmatmul.f32.gmra.mxu0 %v3180_v41  ;;  %771 = vmatmul.f32.gmra.mxu1 %v3048_v34 }
  0x84   : > { %1015 = vmatmul.f32.gmra.mxu3 %v3138_v18  ;;  %v1517_v49 = vsub.f32 %v3204_v59, %v3949_v46  ;;  %v3232_v18 = vand.u32 4294901760, %v392_v0  ;;  %v3258_v26 = vand.u32 4294901760, %v592_v47  ;;  %1751 = vmatpush.msra.mxu1 %v2862_v44  ;;  %4039 = vst [vmem:[#allocation36_spill] sm:$0xff] %v3266_v36 }
  0x86   : > { %895 = vmatmul.f32.gmra.mxu2 %v3116_v1  ;;  %v1518_v38 = vand.u32 4294901760, %v1517_v49  ;;  %v4035_v1 = vand.u32 4294901760, %v2869_v55  ;;  %v3246_v33 = vsub.f32 %v392_v0, %v3232_v18  ;;  %v310_v55 = vld [vmem:[%s3915_s3 + $0x48] sm:$0xff]  ;;  %4037 = vst [vmem:[#allocation34_spill] sm:$0xff] %v3258_v26  ;;  %v390_v0 = vadd.f32 %v358_v12, %v326_v9  ;;  %1753 = vmatpush.msra.mxu1 %v2891_v21  ;;  %v296_v12 = vld [vmem:[%s3914_s2 + $0x58] sm:$0xff] }
  0x87   : > { %1320 = vmatpush.msrb.mxu2 %v3232_v18  ;;  %460 = vperm.xlu0 %2362, %v310_v55   ;;  %v3282_v9 = vsub.f32 %v295_v6, %v3266_v36  ;;  %v3297_v6 = vand.u32 4294901760, %v296_v12 }
  0x88   : > { %1136 = vmatpush.msrb.mxu0 %v4035_v1  ;;  %1519 = vmatpush.msrb.mxu3 %v1518_v38  ;;  %v3948_v1 = vand.u32 4294901760, %v3246_v33  ;;  %v3264_v38 = vand.u32 4294901760, %v3243_v57  ;;  %v3273_v47 = vand.u32 4294901760, %v390_v0 }
  0x89   : > { %1755 = vmatpush.msra.mxu1 %v2915_v52  ;;  %4040 = vst [vmem:[#allocation37_spill] sm:$0xff] %v3282_v9  ;;  %v3305_v19 = vand.u32 4294901760, %v3282_v9 }
  0x8a   : > { %1623 = vmatpush.msra.mxu0 %v2878_v48  ;;  %4038 = vst [vmem:[#allocation35_spill] sm:$0xff] %v3264_v38  ;;  %v1523_v49 = vsub.f32 %v3246_v33, %v3948_v1  ;;  %v600_v55 = vsub.f32 %v3243_v57, %v3264_v38  ;;  %v311_v1 = vld [vmem:[%s3915_s3 + $0x50] sm:$0xff]  ;;  %1322 = vmatpush.msrb.mxu2 %v3273_v47 }
  0x8b   : > { %586 = vmatmul.f32.gmra.mxu0 %v3222_v63  ;;  %775 = vmatmul.f32.gmra.mxu1 %v3098_v30  ;;  %4041 = vst [vmem:[#allocation38_spill] sm:$0xff] %v3297_v6 }
  0x8c   : > { %1021 = vmatmul.f32.gmra.mxu3 %v3183_v15  ;;  %1626 = vmatpush.msra.mxu0 %v2902_v32  ;;  %v1524_v42 = vand.u32 4294901760, %v1523_v49  ;;  %v3288_v49 = vsub.f32 %v390_v0, %v3273_v47  ;;  %v324_v15 = vld [vmem:[%s2640_s13 + $0x38] sm:$0xff]  ;;  %v3302_v0 = vand.u32 4294901760, %v600_v55  ;;  %4043 = vst [vmem:[#allocation40_spill] sm:$0xff] %v3305_v19  ;;  %v3316_v55 = vsub.f32 %v296_v12, %v3297_v6  ;;  %v297_v12 = vld [vmem:[%s3914_s2 + $0x60] sm:$0xff] }
  0x8d   : > { %465 = vperm.xlu1 %2363, %v311_v1   ;;  %1757 = vmatpush.msra.mxu1 %v2930_v37  ;;  %v3344_v14 = vand.u32 4294901760, %v297_v12 }
  0x8e   : > { %900 = vmatmul.f32.gmra.mxu2 %v3158_v27  ;;  %1629 = vmatpush.msra.mxu0 %v2928_v60  ;;  %v3955_v46 = vand.u32 4294901760, %v3288_v49  ;;  %v356_v27 = vld [vmem:[%s2648_s5 + $0x38] sm:$0xff]  ;;  %4042 = vst [vmem:[#allocation39_spill] sm:$0xff] %v3302_v0 }
  0x8f   : > { %1525 = vmatpush.msrb.mxu3 %v1524_v42  ;;  %1759 = vmatpush.msra.mxu1 %v2976_v24  ;;  %4044 = vst [vmem:[#allocation41_spill] sm:$0xff] %v3316_v55  ;;  %v3360_v23 = vsub.f32 %v297_v12, %v3344_v14  ;;  %v320_v12 = vld [vmem:[%s2640_s13 + $0x18] sm:$0xff] }
  0x90   : > { %1632 = vmatpush.msra.mxu0 %v2947_v10  ;;  %v1529_v42 = vsub.f32 %v3288_v49, %v3955_v46 }
  0x91   : > { %1761 = vmatpush.msra.mxu1 %v3024_v28 }
  0x92   : > { %1635 = vmatpush.msra.mxu0 %v2995_v61  ;;  %v1530_v1 = vand.u32 4294901760, %v1529_v42  ;;  %v309_v42 = vld [vmem:[%s3915_s3 + $0x40] sm:$0xff] }
  0x93   : > { %594 = vmatmul.f32.gmra.mxu0 %v3258_v26  ;;  %779 = vmatmul.f32.gmra.mxu1 %v3140_v29  ;;  %v350_v26 = vld [vmem:[%s2648_s5 + $0x8] sm:$0xff] }
  0x94   : > { %1027 = vmatmul.f32.gmra.mxu3 %v3217_v56  ;;  %v388_v56 = vadd.f32 %v356_v27, %v324_v15  ;;  %1638 = vmatpush.msra.mxu0 %v3040_v39  ;;  %v608_v27 = vsub.f32 %v3282_v9, %v3305_v19 }
  0x95   : > { %1531 = vmatpush.msrb.mxu3 %v1530_v1  ;;  %455 = vperm.xlu2 %2364, %v309_v42  }
  0x96   : > { %905 = vmatmul.f32.gmra.mxu2 %v3197_v40  ;;  %v3312_v40 = vand.u32 4294901760, %v388_v56  ;;  %v3342_v1 = vand.u32 4294901760, %v608_v27  ;;  %1641 = vmatpush.msra.mxu0 %v3081_v62 }
  0x97   : > { %1763 = vmatpush.msra.mxu1 %v3068_v22 }
  0x98   : > { %v3324_v15 = vsub.f32 %v388_v56, %v3312_v40  ;;  %1324 = vmatpush.msrb.mxu2 %v3312_v40  ;;  %v3337_v56 = vand.u32 4294901760, %v3316_v55  ;;  %4046 = vst [vmem:[#allocation43_spill] sm:$0xff] %v3342_v1  ;;  %1644 = vmatpush.msra.mxu0 %v3119_v45 }
  0x99   : > { %1765 = vmatpush.msra.mxu1 %v3106_v5 }
  0x9a   : > { %v3962_v46 = vand.u32 4294901760, %v3324_v15  ;;  %4045 = vst [vmem:[#allocation42_spill] sm:$0xff] %v3337_v56  ;;  %v616_v27 = vsub.f32 %v3316_v55, %v3337_v56  ;;  %1647 = vmatpush.msra.mxu0 %v3164_v11 }
  0x9b   : > { %602 = vmatmul.f32.gmra.mxu0 %v3302_v0  ;;  %783 = vmatmul.f32.gmra.mxu1 %v3176_v51 }
  0x9c   : > { %1033 = vmatmul.f32.gmra.mxu3 %v3264_v38  ;;  %v1535_v38 = vsub.f32 %v3324_v15, %v3962_v46  ;;  %v298_v46 = vld [vmem:[%s3914_s2 + $0x68] sm:$0xff]  ;;  %1767 = vmatpush.msra.mxu1 %v3148_v17 }
  0x9d   : > { %v3383_v0 = vand.u32 4294901760, %v298_v46  ;;  %1650 = vmatpush.msra.mxu0 %v3204_v59 }
  0x9e   : > { %910 = vmatmul.f32.gmra.mxu2 %v3243_v57  ;;  %v1536_v42 = vand.u32 4294901760, %v1535_v38  ;;  %v3351_v57 = vand.u32 4294901760, %v386_v16  ;;  %v313_v38 = vld [vmem:[%s3915_s3 + $0x60] sm:$0xff]  ;;  %1769 = vmatpush.msra.mxu1 %v3191_v54 }
  0x9f   : > { %475 = vperm.xlu0 %2362, %v313_v38   ;;  %1653 = vmatpush.msra.mxu0 %v3246_v33 }
  0xa0   : > { %v3363_v35 = vsub.f32 %v386_v16, %v3351_v57  ;;  %1537 = vmatpush.msrb.mxu3 %v1536_v42  ;;  %1326 = vmatpush.msrb.mxu2 %v3351_v57  ;;  %v3375_v16 = vand.u32 4294901760, %v616_v27  ;;  %v3381_v42 = vand.u32 4294901760, %v3360_v23 }
  0xa1   : > { %1771 = vmatpush.msra.mxu1 %v3232_v18  ;;  %1656 = vmatpush.msra.mxu0 %v3288_v49 }
  0xa2   : > { %v3970_v4 = vand.u32 4294901760, %v3363_v35  ;;  %4047 = vst [vmem:[#allocation44_spill] sm:$0xff] %v3375_v16 }
  0xa3   : > { %610 = vmatmul.f32.gmra.mxu0 %v3342_v1  ;;  %787 = vmatmul.f32.gmra.mxu1 %v3224_v8  ;;  %v352_v1 = vld [vmem:[%s2648_s5 + $0x18] sm:$0xff]  ;;  %v624_v8 = vsub.f32 %v3360_v23, %v3381_v42 }
  0xa4   : > { %1039 = vmatmul.f32.gmra.mxu3 %v3305_v19  ;;  %v1541_v19 = vsub.f32 %v3363_v35, %v3970_v4  ;;  %v384_v38 = vadd.f32 %v352_v1, %v320_v12  ;;  %v3399_v1 = vsub.f32 %v298_v46, %v3383_v0  ;;  %v318_v4 = vld [vmem:[%s2640_s13 + $0x8] sm:$0xff]  ;;  %1773 = vmatpush.msra.mxu1 %v3273_v47 }
  0xa5   : > { %v3419_v51 = vand.u32 4294901760, %v624_v8  ;;  %1659 = vmatpush.msra.mxu0 %v3324_v15 }
  0xa6   : > { %915 = vmatmul.f32.gmra.mxu2 %v3282_v9  ;;  %v1542_v27 = vand.u32 4294901760, %v1541_v19  ;;  %v3390_v9 = vand.u32 4294901760, %v384_v38  ;;  %v314_v19 = vld [vmem:[%s3915_s3 + $0x68] sm:$0xff]  ;;  %1775 = vmatpush.msra.mxu1 %v3312_v40 }
  0xa7   : > { %480 = vperm.xlu1 %2363, %v314_v19   ;;  %4048 = vst [vmem:[#allocation45_spill] sm:$0xff] %v3419_v51  ;;  %v4049_v19 = vand.u32 4294901760, %v2878_v48  ;;  %v312_v48 = vld [vmem:[%s3915_s3 + $0x58] sm:$0xff]  ;;  %1662 = vmatpush.msra.mxu0 %v3363_v35 }
  0xa8   : > { %v3402_v12 = vsub.f32 %v384_v38, %v3390_v9  ;;  %1543 = vmatpush.msrb.mxu3 %v1542_v27  ;;  %1328 = vmatpush.msrb.mxu2 %v3390_v9  ;;  %v3422_v27 = vand.u32 4294901760, %v3399_v1 }
  0xa9   : > { %470 = vperm.xlu2 %2364, %v312_v48   ;;  %1777 = vmatpush.msra.mxu1 %v3351_v57  ;;  %v4057_v48 = vand.u32 4294901760, %v3040_v39  ;;  %v4061_v39 = vand.u32 4294901760, %v3204_v59 }
  0xaa   : > { %v3979_v46 = vand.u32 4294901760, %v3402_v12  ;;  %1665 = vmatpush.msra.mxu0 %v3402_v12 }
  0xab   : > { %618 = vmatmul.f32.gmra.mxu0 %v3375_v16  ;;  %791 = vmatmul.f32.gmra.mxu1 %v3266_v36  ;;  %v299_v16 = vld [vmem:[%s3914_s2 + $0x70] sm:$0xff]  ;;  %v382_v36 = vadd.f32 %v350_v26, %v318_v4 }
  0xac   : > { %1045 = vmatmul.f32.gmra.mxu3 %v3337_v56  ;;  %v3424_v63 = vand.u32 4294901760, %v299_v16  ;;  %v1547_v4 = vsub.f32 %v3402_v12, %v3979_v46  ;;  %1779 = vmatpush.msra.mxu1 %v3390_v9 }
  0xad   : > { %v3416_v38 = vand.u32 4294901760, %v382_v36 }
  0xae   : > { %920 = vmatmul.f32.gmra.mxu2 %v3316_v55  ;;  %v1548_v8 = vand.u32 4294901760, %v1547_v4  ;;  %v3445_v46 = vsub.f32 %v299_v16, %v3424_v63  ;;  %v300_v4 = vld [vmem:[%s3914_s2 + $0x78] sm:$0xff]  ;;  %v4050_v55 = vand.u32 4294901760, %v2902_v32  ;;  %v4053_v32 = vand.u32 4294901760, %v2947_v10 }
  0xaf   : > { %1330 = vmatpush.msrb.mxu2 %v3416_v38  ;;  %v3432_v26 = vsub.f32 %v382_v36, %v3416_v38  ;;  %v632_v36 = vsub.f32 %v3399_v1, %v3422_v27  ;;  %v4055_v10 = vand.u32 4294901760, %v2995_v61  ;;  %1781 = vmatpush.msra.mxu1 %v3416_v38  ;;  %v4059_v61 = vand.u32 4294901760, %v3119_v45 }
  0xb0   : > { %1549 = vmatpush.msrb.mxu3 %v1548_v8  ;;  %v4064_v45 = vand.u32 4294901760, %v3324_v15 }
  0xb1   : > { %1882 = vmatpush.msra.mxu2 %v4049_v19  ;;  %v3984_v56 = vand.u32 4294901760, %v3432_v26  ;;  %v3461_v8 = vand.u32 4294901760, %v632_v36  ;;  %1668 = vmatpush.msra.mxu0 %v3432_v26 }
  0xb3   : > { %626 = vmatmul.f32.gmra.mxu0 %v3419_v51  ;;  %795 = vmatmul.f32.gmra.mxu1 %v3297_v6  ;;  %v1553_v19 = vsub.f32 %v3432_v26, %v3984_v56  ;;  %v3464_v51 = vand.u32 4294901760, %v3445_v46  ;;  %v3466_v6 = vand.u32 4294901760, %v300_v4  ;;  %v4052_v56 = vand.u32 4294901760, %v2928_v60 }
  0xb4   : > { %1051 = vmatmul.f32.gmra.mxu3 %v3381_v42  ;;  %1886 = vmatpush.msra.mxu2 %v4050_v55 }
  0xb5   : > { %v1554_v16 = vand.u32 4294901760, %v1553_v19  ;;  %4051 = vst [vmem:[#allocation46_spill] sm:$0xff] %v3464_v51  ;;  %v640_v60 = vsub.f32 %v3445_v46, %v3464_v51  ;;  %v3482_v55 = vsub.f32 %v300_v4, %v3466_v6 }
  0xb6   : > { %925 = vmatmul.f32.gmra.mxu2 %v3360_v23 }
  0xb7   : > { %1890 = vmatpush.msra.mxu2 %v4052_v56  ;;  %1555 = vmatpush.msrb.mxu3 %v1554_v16  ;;  %4054 = vst [vmem:[#allocation47_spill] sm:$0xff] %v3482_v55  ;;  %v3493_v56 = vand.u32 4294901760, %v640_v60  ;;  %v3496_v36 = vand.u32 4294901760, %v3482_v55 }
  0xb9   : > { %2009 = vmatpush.msra.mxu3 %v2862_v44  ;;  %1894 = vmatpush.msra.mxu2 %v4053_v32  ;;  %v316_v44 = vld [vmem:[%s3915_s3 + $0x78] sm:$0xff]  ;;  %4056 = vst [vmem:[#allocation48_spill] sm:$0xff] %v3496_v36 }
  0xba   : > { %490 = vperm.xlu0 %2362, %v316_v44  }
  0xbb   : > { %634 = vmatmul.f32.gmra.mxu0 %v3461_v8  ;;  %799 = vmatmul.f32.gmra.mxu1 %v3344_v14 }
  0xbc   : > { %2011 = vmatpush.msra.mxu3 %v2891_v21  ;;  %1898 = vmatpush.msra.mxu2 %v4055_v10  ;;  %v4058_v21 = vand.u32 4294901760, %v3081_v62 }
  0xbd   : > { %1057 = vmatmul.f32.gmra.mxu3 %v3422_v27 }
  0xbe   : > { %930 = vmatmul.f32.gmra.mxu2 %v3399_v1  ;;  %2013 = vmatpush.msra.mxu3 %v2915_v52  ;;  %v648_v52 = vsub.f32 %v3482_v55, %v3496_v36 }
  0xbf   : > { %1902 = vmatpush.msra.mxu2 %v4057_v48 }
  0xc0   : > { %2015 = vmatpush.msra.mxu3 %v2930_v37  ;;  %v3515_v37 = vand.u32 4294901760, %v648_v52 }
  0xc1   : > { %1906 = vmatpush.msra.mxu2 %v4058_v21 }
  0xc2   : > { %2017 = vmatpush.msra.mxu3 %v2976_v24  ;;  %v4060_v24 = vand.u32 4294901760, %v3164_v11  ;;  %v4066_v11 = vand.u32 4294901760, %v3402_v12 }
  0xc3   : > { %642 = vmatmul.f32.gmra.mxu0 %v3493_v56  ;;  %803 = vmatmul.f32.gmra.mxu1 %v3383_v0 }
  0xc4   : > { %2019 = vmatpush.msra.mxu3 %v3024_v28  ;;  %1910 = vmatpush.msra.mxu2 %v4059_v61  ;;  %v315_v28 = vld [vmem:[%s3915_s3 + $0x70] sm:$0xff] }
  0xc5   : > { %1063 = vmatmul.f32.gmra.mxu3 %v3464_v51  ;;  %485 = vperm.xlu2 %2364, %v315_v28  }
  0xc6   : > { %935 = vmatmul.f32.gmra.mxu2 %v3445_v46  ;;  %2021 = vmatpush.msra.mxu3 %v3068_v22 }
  0xc7   : > { %1914 = vmatpush.msra.mxu2 %v4060_v24 }
  0xc8   : > { %2023 = vmatpush.msra.mxu3 %v3106_v5  ;;  %v4062_v5 = vand.u32 4294901760, %v3246_v33 }
  0xc9   : > { %1918 = vmatpush.msra.mxu2 %v4061_v39 }
  0xca   : > { %2025 = vmatpush.msra.mxu3 %v3148_v17  ;;  %v4063_v17 = vand.u32 4294901760, %v3288_v49 }
  0xcb   : > { %650 = vmatmul.f32.gmra.mxu0 %v3515_v37  ;;  %807 = vmatmul.f32.gmra.mxu1 %v3424_v63 }
  0xcc   : > { %2027 = vmatpush.msra.mxu3 %v3191_v54  ;;  %1922 = vmatpush.msra.mxu2 %v4062_v5  ;;  %v4065_v54 = vand.u32 4294901760, %v3363_v35 }
  0xcd   : > { %1069 = vmatmul.f32.gmra.mxu3 %v3496_v36 }
  0xce   : > { %940 = vmatmul.f32.gmra.mxu2 %v3482_v55  ;;  %2029 = vmatpush.msra.mxu3 %v3232_v18 }
  0xcf   : > { %1926 = vmatpush.msra.mxu2 %v4063_v17  ;;  %v531_v22 = vpop.f32.mrf.mxu0  ;;  %v3536_v62 = vpop.permute.xlu0 %415 }
  0xd0   : > { %2031 = vmatpush.msra.mxu3 %v3273_v47  ;;  %v532_v18 = vadd.f32 %v531_v22, %v3536_v62 }
  0xd1   : > { %1930 = vmatpush.msra.mxu2 %v4064_v45 }
  0xd2   : > { %2033 = vmatpush.msra.mxu3 %v3312_v40 }
  0xd3   : > { %811 = vmatmul.f32.gmra.mxu1 %v3466_v6  ;;  %1138 = vmatmul.f32.vlgmr.msrb.gmra.mxu0 %v2825_v3 }
  0xd4   : > { %1934 = vmatpush.msra.mxu2 %v4065_v54  ;;  %2035 = vmatpush.msra.mxu3 %v3351_v57  ;;  %v4067_v57 = vand.u32 4294901760, %v3432_v26 }
  0xd5   : > { %1557 = vmatmul.f32.vlgmr.msrb.gmra.mxu3 %v2825_v3  ;;  %v3565_v12 = vpop.permute.xlu1 %425 }
  0xd6   : > { %1336 = vmatmul.f32.vlgmr.msrb.gmra.mxu2 %v2909_v50  ;;  %2037 = vmatpush.msra.mxu3 %v3390_v9 }
  0xd7   : > { %1938 = vmatpush.msra.mxu2 %v4066_v11  ;;  %v539_v40 = vpop.f32.mrf.mxu0  ;;  %v980_v49 = vpop.f32.mrf.mxu3 }
  0xd8   : > { %v752_v59 = vpop.f32.mrf.mxu1  ;;  %2039 = vmatpush.msra.mxu3 %v3416_v38  ;;  %v866_v47 = vpop.f32.mrf.mxu2 }
  0xd9   : > { %v753_v33 = vadd.f32 %v752_v59, %v532_v18  ;;  %1942 = vmatpush.msra.mxu2 %v4067_v57  ;;  %v3556_v15 = vpop.permute.xlu0 %420 }
  0xda   : > { %v540_v9 = vadd.f32 %v539_v40, %v3556_v15 }
  0xdb   : > { %v867_v35 = vadd.f32 %v866_v47, %v753_v33  ;;  %1142 = vmatmul.f32.gmra.mxu0 %v2864_v53  ;;  %1235 = vmatmul.f32.vlgmr.msrb.gmra.mxu1 %v2825_v3 }
  0xdd   : > { %v3560_v50 = vadd.f32 %v980_v49, %v867_v35  ;;  %1561 = vmatmul.f32.gmra.mxu3 %v2864_v53 }
  0xde   : > { %1344 = vmatmul.f32.gmra.mxu2 %v2963_v2  ;;  %v3574_v61 = vpop.permute.xlu1 %430 }
  0xdf   : > { %v547_v38 = vpop.f32.mrf.mxu0  ;;  %v986_v16 = vpop.f32.mrf.mxu3 }
  0xe0   : > { %v756_v26 = vpop.f32.mrf.mxu1  ;;  %v871_v19 = vpop.f32.mrf.mxu2  ;;  %v548_v44 = vadd.f32 %v547_v38, %v3565_v12 }
  0xe1   : > { %v757_v4 = vadd.f32 %v756_v26, %v540_v9 }
  0xe3   : > { %v872_v32 = vadd.f32 %v871_v19, %v757_v4  ;;  %1146 = vmatmul.f32.gmra.mxu0 %v2904_v7  ;;  %1239 = vmatmul.f32.gmra.mxu1 %v2864_v53 }
  0xe5   : > { %v3569_v60 = vadd.f32 %v986_v16, %v872_v32  ;;  %1565 = vmatmul.f32.gmra.mxu3 %v2904_v7  ;;  %v3601_v32 = vpop.permute.xlu0 %445 }
  0xe6   : > { %1352 = vmatmul.f32.gmra.mxu2 %v3006_v13  ;;  %v3583_v13 = vpop.permute.xlu2 %435 }
  0xe7   : > { %v992_v52 = vpop.f32.mrf.mxu3 }
  0xe8   : > { %v555_v2 = vpop.f32.mrf.mxu0  ;;  %v760_v10 = vpop.f32.mrf.mxu1 }
  0xe9   : > { %v761_v48 = vadd.f32 %v760_v10, %v548_v44  ;;  %v876_v21 = vpop.f32.mrf.mxu2  ;;  %v556_v28 = vadd.f32 %v555_v2, %v3574_v61 }
  0xeb   : > { %v877_v24 = vadd.f32 %v876_v21, %v761_v48  ;;  %1150 = vmatmul.f32.gmra.mxu0 %v2968_v43  ;;  %1243 = vmatmul.f32.gmra.mxu1 %v2904_v7 }
  0xed   : > { %v3578_v39 = vadd.f32 %v992_v52, %v877_v24  ;;  %1569 = vmatmul.f32.gmra.mxu3 %v2968_v43 }
  0xee   : > { %1360 = vmatmul.f32.gmra.mxu2 %v3052_v58  ;;  %v3592_v57 = vpop.permute.xlu2 %440 }
  0xef   : > { %v998_v54 = vpop.f32.mrf.mxu3 }
  0xf0   : > { %v563_v5 = vpop.f32.mrf.mxu0  ;;  %v764_v17 = vpop.f32.mrf.mxu1 }
  0xf1   : > { %v765_v22 = vadd.f32 %v764_v17, %v556_v28  ;;  %v881_v45 = vpop.f32.mrf.mxu2  ;;  %v564_v40 = vadd.f32 %v563_v5, %v3583_v13  ;;  %v3610_v28 = vpop.permute.xlu1 %450 }
  0xf3   : > { %v882_v18 = vadd.f32 %v881_v45, %v765_v22  ;;  %1154 = vmatmul.f32.gmra.mxu0 %v3002_v20  ;;  %1247 = vmatmul.f32.gmra.mxu1 %v2968_v43  ;;  %v4068_v45 = vld [vmem:[#allocation31_spill] sm:$0xff] }
  0xf5   : > { %v3587_v11 = vadd.f32 %v998_v54, %v882_v18  ;;  %1573 = vmatmul.f32.gmra.mxu3 %v3002_v20 }
  0xf6   : > { %1368 = vmatmul.f32.gmra.mxu2 %v3096_v25 }
  0xf7   : > { %v1004_v49 = vpop.f32.mrf.mxu3 }
  0xf8   : > { %v571_v58 = vpop.f32.mrf.mxu0  ;;  %v768_v59 = vpop.f32.mrf.mxu1 }
  0xf9   : > { %v769_v33 = vadd.f32 %v768_v59, %v564_v40  ;;  %v886_v47 = vpop.f32.mrf.mxu2  ;;  %v572_v38 = vadd.f32 %v571_v58, %v3592_v57  ;;  %v3619_v59 = vpop.permute.xlu2 %455 }
  0xfb   : > { %v887_v35 = vadd.f32 %v886_v47, %v769_v33  ;;  %1158 = vmatmul.f32.gmra.mxu0 %v3048_v34  ;;  %1251 = vmatmul.f32.gmra.mxu1 %v3002_v20  ;;  %v4069_v47 = vld [vmem:[#allocation27_spill] sm:$0xff] }
  0xfd   : > { %v3596_v9 = vadd.f32 %v1004_v49, %v887_v35  ;;  %1577 = vmatmul.f32.gmra.mxu3 %v3048_v34 }
  0xfe   : > { %1376 = vmatmul.f32.gmra.mxu2 %v3131_v31 }
  0xff   : > { %v1010_v16 = vpop.f32.mrf.mxu3 }
 0x100   : > { %v579_v25 = vpop.f32.mrf.mxu0  ;;  %v772_v26 = vpop.f32.mrf.mxu1 }
 0x101   : > { %v773_v4 = vadd.f32 %v772_v26, %v572_v38  ;;  %v891_v19 = vpop.f32.mrf.mxu2  ;;  %v580_v10 = vadd.f32 %v579_v25, %v3601_v32  ;;  %v4070_v38 = vld [vmem:[#allocation34_spill] sm:$0xff] }
 0x103   : > { %v892_v44 = vadd.f32 %v891_v19, %v773_v4  ;;  %1162 = vmatmul.f32.gmra.mxu0 %v3098_v30  ;;  %1255 = vmatmul.f32.gmra.mxu1 %v3048_v34 }
 0x105   : > { %v3605_v2 = vadd.f32 %v1010_v16, %v892_v44  ;;  %1581 = vmatmul.f32.gmra.mxu3 %v3098_v30  ;;  %v3628_v44 = vpop.permute.xlu0 %460 }
 0x106   : > { %1384 = vmatmul.f32.gmra.mxu2 %v3180_v41 }
 0x107   : > { %v1016_v24 = vpop.f32.mrf.mxu3 }
 0x108   : > { %v587_v31 = vpop.f32.mrf.mxu0  ;;  %v776_v48 = vpop.f32.mrf.mxu1 }
 0x109   : > { %v777_v21 = vadd.f32 %v776_v48, %v580_v10  ;;  %v896_v52 = vpop.f32.mrf.mxu2  ;;  %v588_v22 = vadd.f32 %v587_v31, %v3610_v28  ;;  %v4071_v31 = vld [vmem:[#allocation32_spill] sm:$0xff] }
 0x10b   : > { %v897_v5 = vadd.f32 %v896_v52, %v777_v21  ;;  %1166 = vmatmul.f32.gmra.mxu0 %v3140_v29  ;;  %1259 = vmatmul.f32.gmra.mxu1 %v3098_v30  ;;  %v4072_v52 = vld [vmem:[#allocation39_spill] sm:$0xff] }
 0x10d   : > { %v3614_v17 = vadd.f32 %v1016_v24, %v897_v5  ;;  %1585 = vmatmul.f32.gmra.mxu3 %v3140_v29 }
 0x10e   : > { %1392 = vmatmul.f32.gmra.mxu2 %v4068_v45 }
 0x10f   : > { %v1022_v58 = vpop.f32.mrf.mxu3 }
 0x110   : > { %v595_v41 = vpop.f32.mrf.mxu0  ;;  %v780_v54 = vpop.f32.mrf.mxu1 }
 0x111   : > { %v781_v18 = vadd.f32 %v780_v54, %v588_v22  ;;  %v901_v40 = vpop.f32.mrf.mxu2  ;;  %v596_v35 = vadd.f32 %v595_v41, %v3619_v59  ;;  %v3637_v54 = vpop.permute.xlu1 %465 }
 0x113   : > { %v902_v33 = vadd.f32 %v901_v40, %v781_v18  ;;  %1170 = vmatmul.f32.gmra.mxu0 %v4069_v47  ;;  %1263 = vmatmul.f32.gmra.mxu1 %v3140_v29  ;;  %v4073_v40 = vld [vmem:[#allocation36_spill] sm:$0xff] }
 0x115   : > { %v3623_v49 = vadd.f32 %v1022_v58, %v902_v33  ;;  %1589 = vmatmul.f32.gmra.mxu3 %v4069_v47 }
 0x116   : > { %1400 = vmatmul.f32.gmra.mxu2 %v4070_v38 }
 0x117   : > { %v1028_v16 = vpop.f32.mrf.mxu3 }
 0x118   : > { %v603_v25 = vpop.f32.mrf.mxu0  ;;  %v784_v26 = vpop.f32.mrf.mxu1 }
 0x119   : > { %v785_v4 = vadd.f32 %v784_v26, %v596_v35  ;;  %v906_v19 = vpop.f32.mrf.mxu2  ;;  %v604_v21 = vadd.f32 %v603_v25, %v3628_v44  ;;  %v4074_v35 = vld [vmem:[#allocation43_spill] sm:$0xff]  ;;  %v3664_v36 = vpop.permute.xlu1 %480 }
 0x11b   : > { %v907_v10 = vadd.f32 %v906_v19, %v785_v4  ;;  %1174 = vmatmul.f32.gmra.mxu0 %v4071_v31  ;;  %1267 = vmatmul.f32.gmra.mxu1 %v4069_v47 }
 0x11d   : > { %v3632_v48 = vadd.f32 %v1028_v16, %v907_v10  ;;  %1593 = vmatmul.f32.gmra.mxu3 %v4071_v31  ;;  %v3646_v16 = vpop.permute.xlu2 %470 }
 0x11e   : > { %1408 = vmatmul.f32.gmra.mxu2 %v4072_v52 }
 0x11f   : > { %v1034_v41 = vpop.f32.mrf.mxu3 }
 0x120   : > { %v611_v24 = vpop.f32.mrf.mxu0  ;;  %v788_v5 = vpop.f32.mrf.mxu1 }
 0x121   : > { %v789_v22 = vadd.f32 %v788_v5, %v604_v21  ;;  %v911_v45 = vpop.f32.mrf.mxu2  ;;  %v612_v33 = vadd.f32 %v611_v24, %v3637_v54  ;;  %v4075_v21 = vld [vmem:[#allocation38_spill] sm:$0xff]  ;;  %v4076_v5 = vld [vmem:[#allocation44_spill] sm:$0xff] }
 0x123   : > { %v912_v18 = vadd.f32 %v911_v45, %v789_v22  ;;  %1178 = vmatmul.f32.gmra.mxu0 %v4073_v40  ;;  %1271 = vmatmul.f32.gmra.mxu1 %v4071_v31 }
 0x125   : > { %v3641_v58 = vadd.f32 %v1034_v41, %v912_v18  ;;  %1597 = vmatmul.f32.gmra.mxu3 %v4073_v40  ;;  %v3673_v51 = vpop.permute.xlu2 %485 }
 0x126   : > { %1416 = vmatmul.f32.gmra.mxu2 %v4074_v35  ;;  %v3655_v35 = vpop.permute.xlu0 %475  ;;  %4078 = vst [vmem:[#allocation31_spill] sm:$0xff] %v3673_v51 }
 0x127   : > { %v1040_v19 = vpop.f32.mrf.mxu3 }
 0x128   : > { %v619_v38 = vpop.f32.mrf.mxu0  ;;  %v792_v25 = vpop.f32.mrf.mxu1 }
 0x129   : > { %v793_v26 = vadd.f32 %v792_v25, %v612_v33  ;;  %v916_v4 = vpop.f32.mrf.mxu2  ;;  %v620_v24 = vadd.f32 %v619_v38, %v3646_v16 }
 0x12b   : > { %v917_v10 = vadd.f32 %v916_v4, %v793_v26  ;;  %1182 = vmatmul.f32.gmra.mxu0 %v4075_v21  ;;  %1275 = vmatmul.f32.gmra.mxu1 %v4073_v40  ;;  %v4077_v4 = vld [vmem:[#allocation45_spill] sm:$0xff] }
 0x12d   : > { %v3650_v52 = vadd.f32 %v1040_v19, %v917_v10  ;;  %1601 = vmatmul.f32.gmra.mxu3 %v4075_v21 }
 0x12e   : > { %1424 = vmatmul.f32.gmra.mxu2 %v4076_v5  ;;  %v3682_v55 = vpop.permute.xlu0 %490 }
 0x12f   : > { %v1046_v33 = vpop.f32.mrf.mxu3  ;;  %4079 = vst [vmem:[#allocation27_spill] sm:$0xff] %v3682_v55 }
 0x130   : > { %v627_v22 = vpop.f32.mrf.mxu0  ;;  %v796_v45 = vpop.f32.mrf.mxu1 }
 0x131   : > { %v797_v41 = vadd.f32 %v796_v45, %v620_v24  ;;  %v921_v18 = vpop.f32.mrf.mxu2  ;;  %v628_v38 = vadd.f32 %v627_v22, %v3655_v35 }
 0x133   : > { %v922_v25 = vadd.f32 %v921_v18, %v797_v41  ;;  %1186 = vmatmul.f32.gmra.mxu0 %v3344_v14  ;;  %1279 = vmatmul.f32.gmra.mxu1 %v4075_v21 }
 0x135   : > { %v3659_v26 = vadd.f32 %v1046_v33, %v922_v25  ;;  %1605 = vmatmul.f32.gmra.mxu3 %v3344_v14 }
 0x136   : > { %1432 = vmatmul.f32.gmra.mxu2 %v4077_v4 }
 0x137   : > { %v1052_v45 = vpop.f32.mrf.mxu3 }
 0x138   : > { %v635_v19 = vpop.f32.mrf.mxu0  ;;  %v800_v10 = vpop.f32.mrf.mxu1 }
 0x139   : > { %v801_v24 = vadd.f32 %v800_v10, %v628_v38  ;;  %v926_v5 = vpop.f32.mrf.mxu2  ;;  %v636_v22 = vadd.f32 %v635_v19, %v3664_v36 }
 0x13b   : > { %v927_v41 = vadd.f32 %v926_v5, %v801_v24  ;;  %1190 = vmatmul.f32.gmra.mxu0 %v3383_v0  ;;  %1283 = vmatmul.f32.gmra.mxu1 %v3344_v14 }
 0x13d   : > { %v3668_v18 = vadd.f32 %v1052_v45, %v927_v41  ;;  %1609 = vmatmul.f32.gmra.mxu3 %v3383_v0 }
 0x13e   : > { %1440 = vmatmul.f32.gmra.mxu2 %v3461_v8 }
 0x140   : > { %v643_v33 = vpop.f32.mrf.mxu0  ;;  %v804_v25 = vpop.f32.mrf.mxu1 }
 0x141   : > { %v805_v38 = vadd.f32 %v804_v25, %v636_v22  ;;  %v931_v4 = vpop.f32.mrf.mxu2  ;;  %v1058_v10 = vpop.f32.mrf.mxu3  ;;  %v644_v19 = vadd.f32 %v643_v33, %v3673_v51 }
 0x143   : > { %v932_v24 = vadd.f32 %v931_v4, %v805_v38  ;;  %1194 = vmatmul.f32.gmra.mxu0 %v3424_v63  ;;  %1287 = vmatmul.f32.gmra.mxu1 %v3383_v0 }
 0x145   : > { %v3677_v5 = vadd.f32 %v1058_v10, %v932_v24  ;;  %1613 = vmatmul.f32.gmra.mxu3 %v3424_v63 }
 0x146   : > { %1448 = vmatmul.f32.gmra.mxu2 %v3493_v56 }
 0x148   : > { %v651_v8 = vpop.f32.mrf.mxu0  ;;  %v808_v45 = vpop.f32.mrf.mxu1 }
 0x149   : > { %v809_v41 = vadd.f32 %v808_v45, %v644_v19  ;;  %v936_v22 = vpop.f32.mrf.mxu2  ;;  %v1064_v25 = vpop.f32.mrf.mxu3  ;;  %v652_v33 = vadd.f32 %v651_v8, %v3682_v55 }
 0x14b   : > { %v937_v38 = vadd.f32 %v936_v22, %v809_v41  ;;  %1198 = vmatmul.f32.gmra.mxu0 %v3466_v6  ;;  %1291 = vmatmul.f32.gmra.mxu1 %v3424_v63  ;;  %v4080_v41 = vld [vmem:[#allocation12_spill] sm:$0xff] }
 0x14d   : > { %v3686_v4 = vadd.f32 %v1064_v25, %v937_v38  ;;  %1617 = vmatmul.f32.gmra.mxu3 %v3466_v6 }
 0x14e   : > { %1456 = vmatmul.f32.gmra.mxu2 %v3515_v37 }
 0x150   : > { %v812_v56 = vpop.f32.mrf.mxu1  ;;  %v1139_v10 = vpop.f32.mrf.mxu0 }
 0x151   : > { %v813_v24 = vadd.f32 %v812_v56, %v652_v33  ;;  %v941_v19 = vpop.f32.mrf.mxu2  ;;  %v1070_v45 = vpop.f32.mrf.mxu3  ;;  %v1140_v8 = vadd.f32 %v1139_v10, %v3560_v50 }
 0x153   : > { %v942_v51 = vadd.f32 %v941_v19, %v813_v24  ;;  %1295 = vmatmul.f32.gmra.mxu1 %v3466_v6  ;;  %1671 = vmatmul.f32.vlgmr.msra.gmra.mxu0 %v4080_v41  ;;  %v4082_v24 = vld [vmem:[#allocation13_spill] sm:$0xff] }
 0x155   : > { %v3693_v22 = vadd.f32 %v1070_v45, %v942_v51  ;;  %2041 = vmatmul.f32.vlgmr.msra.gmra.mxu3 %v2825_v3  ;;  %v4081_v51 = vld [vmem:[#allocation14_spill] sm:$0xff] }
 0x156   : > { %1944 = vmatmul.f32.vlgmr.msra.gmra.mxu2 %v2825_v3 }
 0x158   : > { %v1143_v37 = vpop.f32.mrf.mxu0  ;;  %v1236_v25 = vpop.f32.mrf.mxu1 }
 0x159   : > { %v1237_v38 = vadd.f32 %v1236_v25, %v1140_v8  ;;  %v1337_v33 = vpop.f32.mrf.mxu2  ;;  %v1558_v56 = vpop.f32.mrf.mxu3  ;;  %v1144_v3 = vadd.f32 %v1143_v37, %v3569_v60  ;;  %v4083_v25 = vld [vmem:[#allocation16_spill] sm:$0xff] }
 0x15a   : > { %v1338_v55 = vadd.f32 %v1337_v33, %v3536_v62 }
 0x15b   : > { %2105 = vst [vmem:[%s3700_s26] sm:$0xff] %v1237_v38  ;;  %1676 = vmatmul.f32.gmra.mxu0 %v4081_v51  ;;  %1785 = vmatmul.f32.vlgmr.msra.gmra.mxu1 %v4082_v24  ;;  %v4084_v38 = vld [vmem:[#allocation15_spill] sm:$0xff]  ;;  %v4085_v24 = vld [vmem:[#allocation18_spill] sm:$0xff] }
 0x15c   : > { %v3705_v19 = vadd.f32 %v1558_v56, %v1338_v55 }
 0x15d   : > { %2045 = vmatmul.f32.gmra.mxu3 %v2864_v53 }
 0x15e   : > { %1948 = vmatmul.f32.gmra.mxu2 %v2864_v53 }
 0x160   : > { %v1147_v50 = vpop.f32.mrf.mxu0  ;;  %v1240_v10 = vpop.f32.mrf.mxu1 }
 0x161   : > { %v1241_v62 = vadd.f32 %v1240_v10, %v1144_v3  ;;  %v1345_v45 = vpop.f32.mrf.mxu2  ;;  %v1562_v41 = vpop.f32.mrf.mxu3  ;;  %v1148_v53 = vadd.f32 %v1147_v50, %v3578_v39  ;;  %v4086_v3 = vld [vmem:[#allocation17_spill] sm:$0xff] }
 0x162   : > { %v1346_v8 = vadd.f32 %v1345_v45, %v3556_v15 }
 0x163   : > { %2107 = vst [vmem:[%s3700_s26 + $0x10] sm:$0xff] %v1241_v62  ;;  %1681 = vmatmul.f32.gmra.mxu0 %v4083_v25  ;;  %1791 = vmatmul.f32.gmra.mxu1 %v4084_v38  ;;  %v4088_v25 = vld [vmem:[#allocation19_spill] sm:$0xff] }
 0x164   : > { %v3714_v55 = vadd.f32 %v1562_v41, %v1346_v8  ;;  %v4087_v8 = vld [vmem:[#allocation20_spill] sm:$0xff] }
 0x165   : > { %2049 = vmatmul.f32.gmra.mxu3 %v2904_v7 }
 0x166   : > { %1952 = vmatmul.f32.gmra.mxu2 %v2904_v7 }
 0x168   : > { %v1151_v60 = vpop.f32.mrf.mxu0  ;;  %v1244_v37 = vpop.f32.mrf.mxu1 }
 0x169   : > { %v1245_v33 = vadd.f32 %v1244_v37, %v1148_v53  ;;  %v1353_v56 = vpop.f32.mrf.mxu2  ;;  %v1566_v51 = vpop.f32.mrf.mxu3  ;;  %v1152_v7 = vadd.f32 %v1151_v60, %v3587_v11 }
 0x16a   : > { %v1354_v15 = vadd.f32 %v1353_v56, %v3565_v12  ;;  %v4089_v56 = vld [vmem:[#allocation22_spill] sm:$0xff] }
 0x16b   : > { %2109 = vst [vmem:[%s3700_s26 + $0x20] sm:$0xff] %v1245_v33  ;;  %1686 = vmatmul.f32.gmra.mxu0 %v4085_v24  ;;  %1797 = vmatmul.f32.gmra.mxu1 %v4086_v3 }
 0x16c   : > { %v3723_v10 = vadd.f32 %v1566_v51, %v1354_v15  ;;  %v4090_v51 = vld [vmem:[#allocation21_spill] sm:$0xff] }
 0x16d   : > { %2053 = vmatmul.f32.gmra.mxu3 %v2968_v43 }
 0x16e   : > { %1956 = vmatmul.f32.gmra.mxu2 %v2968_v43 }
 0x170   : > { %v1155_v39 = vpop.f32.mrf.mxu0  ;;  %v1248_v50 = vpop.f32.mrf.mxu1 }
 0x171   : > { %v1249_v62 = vadd.f32 %v1248_v50, %v1152_v7  ;;  %v1361_v45 = vpop.f32.mrf.mxu2  ;;  %v1570_v41 = vpop.f32.mrf.mxu3  ;;  %v1156_v43 = vadd.f32 %v1155_v39, %v3596_v9  ;;  %v4091_v50 = vld [vmem:[#allocation24_spill] sm:$0xff] }
 0x172   : > { %v1362_v12 = vadd.f32 %v1361_v45, %v3574_v61 }
 0x173   : > { %2111 = vst [vmem:[%s3700_s26 + $0x30] sm:$0xff] %v1249_v62  ;;  %1691 = vmatmul.f32.gmra.mxu0 %v4087_v8  ;;  %1803 = vmatmul.f32.gmra.mxu1 %v4088_v25  ;;  %v4092_v62 = vld [vmem:[#allocation23_spill] sm:$0xff] }
 0x174   : > { %v3732_v38 = vadd.f32 %v1570_v41, %v1362_v12 }
 0x175   : > { %2057 = vmatmul.f32.gmra.mxu3 %v3002_v20 }
 0x176   : > { %1960 = vmatmul.f32.gmra.mxu2 %v3002_v20 }
 0x178   : > { %v1159_v11 = vpop.f32.mrf.mxu0  ;;  %v1252_v53 = vpop.f32.mrf.mxu1 }
 0x179   : > { %v1253_v60 = vadd.f32 %v1252_v53, %v1156_v43  ;;  %v1369_v37 = vpop.f32.mrf.mxu2  ;;  %v1574_v33 = vpop.f32.mrf.mxu3  ;;  %v1160_v20 = vadd.f32 %v1159_v11, %v3605_v2  ;;  %v4093_v43 = vld [vmem:[#allocation26_spill] sm:$0xff]  ;;  %v4094_v11 = vld [vmem:[#allocation25_spill] sm:$0xff] }
 0x17a   : > { %v1370_v61 = vadd.f32 %v1369_v37, %v3583_v13 }
 0x17b   : > { %2113 = vst [vmem:[%s3700_s26 + $0x40] sm:$0xff] %v1253_v60  ;;  %1696 = vmatmul.f32.gmra.mxu0 %v4089_v56  ;;  %1809 = vmatmul.f32.gmra.mxu1 %v4090_v51  ;;  %v4095_v56 = vld [vmem:[#allocation29_spill] sm:$0xff]  ;;  %v4096_v51 = vld [vmem:[#allocation28_spill] sm:$0xff] }
 0x17c   : > { %v3741_v15 = vadd.f32 %v1574_v33, %v1370_v61 }
 0x17d   : > { %2061 = vmatmul.f32.gmra.mxu3 %v3048_v34 }
 0x17e   : > { %1964 = vmatmul.f32.gmra.mxu2 %v3048_v34 }
 0x180   : > { %v1163_v9 = vpop.f32.mrf.mxu0  ;;  %v1256_v24 = vpop.f32.mrf.mxu1 }
 0x181   : > { %v1257_v3 = vadd.f32 %v1256_v24, %v1160_v20  ;;  %v1377_v7 = vpop.f32.mrf.mxu2  ;;  %v1578_v39 = vpop.f32.mrf.mxu3  ;;  %v1164_v34 = vadd.f32 %v1163_v9, %v3614_v17 }
 0x182   : > { %v1378_v13 = vadd.f32 %v1377_v7, %v3592_v57 }
 0x183   : > { %2115 = vst [vmem:[%s3700_s26 + $0x50] sm:$0xff] %v1257_v3  ;;  %1701 = vmatmul.f32.gmra.mxu0 %v4091_v50  ;;  %1815 = vmatmul.f32.gmra.mxu1 %v4092_v62 }
 0x184   : > { %v3750_v45 = vadd.f32 %v1578_v39, %v1378_v13  ;;  %v4097_v39 = vld [vmem:[#allocation33_spill] sm:$0xff]  ;;  %v4098_v13 = vld [vmem:[#allocation30_spill] sm:$0xff] }
 0x185   : > { %2065 = vmatmul.f32.gmra.mxu3 %v3098_v30 }
 0x186   : > { %1968 = vmatmul.f32.gmra.mxu2 %v3098_v30 }
 0x188   : > { %v1167_v2 = vpop.f32.mrf.mxu0  ;;  %v1260_v41 = vpop.f32.mrf.mxu1 }
 0x189   : > { %v1261_v12 = vadd.f32 %v1260_v41, %v1164_v34  ;;  %v1385_v8 = vpop.f32.mrf.mxu2  ;;  %v1582_v25 = vpop.f32.mrf.mxu3  ;;  %v1168_v30 = vadd.f32 %v1167_v2, %v3623_v49 }
 0x18a   : > { %v1386_v57 = vadd.f32 %v1385_v8, %v3601_v32  ;;  %v4100_v8 = vld [vmem:[#allocation35_spill] sm:$0xff] }
 0x18b   : > { %2117 = vst [vmem:[%s3700_s26 + $0x60] sm:$0xff] %v1261_v12  ;;  %1706 = vmatmul.f32.gmra.mxu0 %v4093_v43  ;;  %1821 = vmatmul.f32.gmra.mxu1 %v4094_v11  ;;  %v4099_v12 = vld [vmem:[#allocation37_spill] sm:$0xff] }
 0x18c   : > { %v3759_v53 = vadd.f32 %v1582_v25, %v1386_v57 }
 0x18d   : > { %2069 = vmatmul.f32.gmra.mxu3 %v3140_v29 }
 0x18e   : > { %1972 = vmatmul.f32.gmra.mxu2 %v3140_v29 }
 0x190   : > { %v1171_v17 = vpop.f32.mrf.mxu0  ;;  %v1264_v60 = vpop.f32.mrf.mxu1 }
 0x191   : > { %v1265_v37 = vadd.f32 %v1264_v60, %v1168_v30  ;;  %v1393_v33 = vpop.f32.mrf.mxu2  ;;  %v1586_v61 = vpop.f32.mrf.mxu3  ;;  %v1172_v29 = vadd.f32 %v1171_v17, %v3632_v48  ;;  %v4101_v17 = vld [vmem:[#allocation41_spill] sm:$0xff]  ;;  %v4102_v60 = vld [vmem:[#allocation40_spill] sm:$0xff] }
 0x192   : > { %v1394_v32 = vadd.f32 %v1393_v33, %v3610_v28 }
 0x193   : > { %2119 = vst [vmem:[%s3700_s26 + $0x70] sm:$0xff] %v1265_v37  ;;  %1711 = vmatmul.f32.gmra.mxu0 %v4095_v56  ;;  %1827 = vmatmul.f32.gmra.mxu1 %v4096_v51  ;;  %v4103_v51 = vld [vmem:[#allocation42_spill] sm:$0xff] }
 0x194   : > { %v3768_v20 = vadd.f32 %v1586_v61, %v1394_v32 }
 0x195   : > { %2073 = vmatmul.f32.gmra.mxu3 %v4069_v47 }
 0x196   : > { %1976 = vmatmul.f32.gmra.mxu2 %v4069_v47 }
 0x198   : > { %v1175_v49 = vpop.f32.mrf.mxu0  ;;  %v1268_v9 = vpop.f32.mrf.mxu1 }
 0x199   : > { %v1269_v24 = vadd.f32 %v1268_v9, %v1172_v29  ;;  %v1401_v3 = vpop.f32.mrf.mxu2  ;;  %v1590_v7 = vpop.f32.mrf.mxu3  ;;  %v1176_v47 = vadd.f32 %v1175_v49, %v3641_v58 }
 0x19a   : > { %v1402_v28 = vadd.f32 %v1401_v3, %v3619_v59 }
 0x19b   : > { %2121 = vst [vmem:[%s3700_s26 + $0x80] sm:$0xff] %v1269_v24  ;;  %1716 = vmatmul.f32.gmra.mxu0 %v4097_v39  ;;  %1833 = vmatmul.f32.gmra.mxu1 %v4098_v13 }
 0x19c   : > { %v3777_v50 = vadd.f32 %v1590_v7, %v1402_v28 }
 0x19d   : > { %2077 = vmatmul.f32.gmra.mxu3 %v4071_v31 }
 0x19e   : > { %1980 = vmatmul.f32.gmra.mxu2 %v4071_v31 }
 0x1a0   : > { %v1179_v48 = vpop.f32.mrf.mxu0  ;;  %v1272_v62 = vpop.f32.mrf.mxu1 }
 0x1a1   : > { %v1273_v34 = vadd.f32 %v1272_v62, %v1176_v47  ;;  %v1409_v2 = vpop.f32.mrf.mxu2  ;;  %v1594_v41 = vpop.f32.mrf.mxu3  ;;  %v1180_v31 = vadd.f32 %v1179_v48, %v3650_v52 }
 0x1a2   : > { %v1410_v59 = vadd.f32 %v1409_v2, %v3628_v44 }
 0x1a3   : > { %2123 = vst [vmem:[%s3700_s26 + $0x90] sm:$0xff] %v1273_v34  ;;  %1721 = vmatmul.f32.gmra.mxu0 %v4099_v12  ;;  %1839 = vmatmul.f32.gmra.mxu1 %v4100_v8 }
 0x1a4   : > { %v3786_v25 = vadd.f32 %v1594_v41, %v1410_v59 }
 0x1a5   : > { %2081 = vmatmul.f32.gmra.mxu3 %v4073_v40 }
 0x1a6   : > { %1984 = vmatmul.f32.gmra.mxu2 %v4073_v40 }
 0x1a8   : > { %v1183_v58 = vpop.f32.mrf.mxu0  ;;  %v1276_v57 = vpop.f32.mrf.mxu1 }
 0x1a9   : > { %v1277_v43 = vadd.f32 %v1276_v57, %v1180_v31  ;;  %v1417_v11 = vpop.f32.mrf.mxu2  ;;  %v1598_v30 = vpop.f32.mrf.mxu3  ;;  %v1184_v40 = vadd.f32 %v1183_v58, %v3659_v26  ;;  %v4107_v31 = vld [vmem:[#allocation27_spill] sm:$0xff]  ;;  %v4108_v57 = vld [vmem:[#allocation48_spill] sm:$0xff] }
 0x1aa   : > { %v1418_v44 = vadd.f32 %v1417_v11, %v3637_v54 }
 0x1ab   : > { %2125 = vst [vmem:[%s3700_s26 + $0xa0] sm:$0xff] %v1277_v43  ;;  %1726 = vmatmul.f32.gmra.mxu0 %v4101_v17  ;;  %1845 = vmatmul.f32.gmra.mxu1 %v4102_v60 }
 0x1ac   : > { %v3795_v37 = vadd.f32 %v1598_v30, %v1418_v44 }
 0x1ad   : > { %2085 = vmatmul.f32.gmra.mxu3 %v4075_v21 }
 0x1ae   : > { %1988 = vmatmul.f32.gmra.mxu2 %v4075_v21 }
 0x1b0   : > { %v1187_v52 = vpop.f32.mrf.mxu0  ;;  %v1280_v33 = vpop.f32.mrf.mxu1 }
 0x1b1   : > { %v1281_v61 = vadd.f32 %v1280_v33, %v1184_v40  ;;  %v1425_v32 = vpop.f32.mrf.mxu2  ;;  %v1602_v56 = vpop.f32.mrf.mxu3  ;;  %v1188_v21 = vadd.f32 %v1187_v52, %v3668_v18 }
 0x1b2   : > { %v1426_v54 = vadd.f32 %v1425_v32, %v3646_v16 }
 0x1b3   : > { %2127 = vst [vmem:[%s3700_s26 + $0xb0] sm:$0xff] %v1281_v61  ;;  %1731 = vmatmul.f32.gmra.mxu0 %v3360_v23  ;;  %1851 = vmatmul.f32.gmra.mxu1 %v4103_v51 }
 0x1b4   : > { %v3804_v29 = vadd.f32 %v1602_v56, %v1426_v54 }
 0x1b5   : > { %2089 = vmatmul.f32.gmra.mxu3 %v3344_v14 }
 0x1b6   : > { %1992 = vmatmul.f32.gmra.mxu2 %v3344_v14 }
 0x1b8   : > { %v1191_v26 = vpop.f32.mrf.mxu0  ;;  %v1284_v49 = vpop.f32.mrf.mxu1 }
 0x1b9   : > { %v1285_v9 = vadd.f32 %v1284_v49, %v1188_v21  ;;  %v1433_v24 = vpop.f32.mrf.mxu2  ;;  %v1606_v3 = vpop.f32.mrf.mxu3  ;;  %v1192_v14 = vadd.f32 %v1191_v26, %v3677_v5 }
 0x1ba   : > { %v1434_v16 = vadd.f32 %v1433_v24, %v3655_v35 }
 0x1bb   : > { %2129 = vst [vmem:[%s3700_s26 + $0xc0] sm:$0xff] %v1285_v9  ;;  %1736 = vmatmul.f32.gmra.mxu0 %v3399_v1  ;;  %1857 = vmatmul.f32.gmra.mxu1 %v3381_v42 }
 0x1bc   : > { %v3813_v23 = vadd.f32 %v1606_v3, %v1434_v16 }
 0x1bd   : > { %2093 = vmatmul.f32.gmra.mxu3 %v3383_v0 }
 0x1be   : > { %1996 = vmatmul.f32.gmra.mxu2 %v3383_v0 }
 0x1c0   : > { %v1195_v18 = vpop.f32.mrf.mxu0  ;;  %v1288_v7 = vpop.f32.mrf.mxu1 }
 0x1c1   : > { %v1289_v28 = vadd.f32 %v1288_v7, %v1192_v14  ;;  %v1441_v39 = vpop.f32.mrf.mxu2  ;;  %v1610_v13 = vpop.f32.mrf.mxu3  ;;  %v1196_v0 = vadd.f32 %v1195_v18, %v3686_v4 }
 0x1c2   : > { %v1442_v35 = vadd.f32 %v1441_v39, %v3664_v36  ;;  %v4104_v36 = vld [vmem:[#allocation31_spill] sm:$0xff] }
 0x1c3   : > { %2131 = vst [vmem:[%s3700_s26 + $0xd0] sm:$0xff] %v1289_v28  ;;  %1741 = vmatmul.f32.gmra.mxu0 %v3445_v46  ;;  %1863 = vmatmul.f32.gmra.mxu1 %v3422_v27  ;;  %v4105_v46 = vld [vmem:[#allocation47_spill] sm:$0xff]  ;;  %v4106_v27 = vld [vmem:[#allocation46_spill] sm:$0xff] }
 0x1c4   : > { %v3822_v42 = vadd.f32 %v1610_v13, %v1442_v35 }
 0x1c5   : > { %2097 = vmatmul.f32.gmra.mxu3 %v3424_v63 }
 0x1c6   : > { %2000 = vmatmul.f32.gmra.mxu2 %v3424_v63 }
 0x1c8   : > { %v1199_v1 = vpop.f32.mrf.mxu0  ;;  %v1292_v5 = vpop.f32.mrf.mxu1 }
 0x1c9   : > { %v1293_v47 = vadd.f32 %v1292_v5, %v1196_v0  ;;  %v1449_v48 = vpop.f32.mrf.mxu2  ;;  %v1614_v62 = vpop.f32.mrf.mxu3  ;;  %v1200_v63 = vadd.f32 %v1199_v1, %v3693_v22 }
 0x1ca   : > { %v1450_v34 = vadd.f32 %v1449_v48, %v4104_v36 }
 0x1cb   : > { %2133 = vst [vmem:[%s3700_s26 + $0xe0] sm:$0xff] %v1293_v47  ;;  %1746 = vmatmul.f32.gmra.mxu0 %v4105_v46  ;;  %1869 = vmatmul.f32.gmra.mxu1 %v4106_v27 }
 0x1cc   : > { %v3831_v2 = vadd.f32 %v1614_v62, %v1450_v34 }
 0x1cd   : > { %2101 = vmatmul.f32.gmra.mxu3 %v3466_v6 }
 0x1ce   : > { %2004 = vmatmul.f32.gmra.mxu2 %v3466_v6 }
 0x1d0   : > { %v1296_v4 = vpop.f32.mrf.mxu1  ;;  %v1672_v41 = vpop.f32.mrf.mxu0 }
 0x1d1   : > { %v1297_v59 = vadd.f32 %v1296_v4, %v1200_v63  ;;  %v1457_v12 = vpop.f32.mrf.mxu2  ;;  %v1618_v8 = vpop.f32.mrf.mxu3  ;;  %v1673_v11 = vadd.f32 %v1672_v41, %v3705_v19 }
 0x1d2   : > { %v1458_v58 = vadd.f32 %v1457_v12, %v4107_v31 }
 0x1d3   : > { %2135 = vst [vmem:[%s3700_s26 + $0xf0] sm:$0xff] %v1297_v59  ;;  %1875 = vmatmul.f32.gmra.mxu1 %v4108_v57 }
 0x1d4   : > { %v3839_v43 = vadd.f32 %v1618_v8, %v1458_v58 }
 0x1d8   : > { %v1677_v30 = vpop.f32.mrf.mxu0  ;;  %v1786_v44 = vpop.f32.mrf.mxu1 }
 0x1d9   : > { %v1787_v6 = vadd.f32 %v1786_v44, %v1673_v11  ;;  %v1945_v22 = vpop.f32.mrf.mxu2  ;;  %v2042_v17 = vpop.f32.mrf.mxu3  ;;  %v1678_v52 = vadd.f32 %v1677_v30, %v3714_v55 }
 0x1db   : > { %v1946_v60 = vadd.f32 %v1945_v22, %v1787_v6 }
 0x1dd   : > { %v2043_v40 = vadd.f32 %v2042_v17, %v1946_v60 }
 0x1df   : > { %2106 = vst [vmem:[%s3700_s26 + $0x8] sm:$0xff] %v2043_v40 }
 0x1e0   : > { %v1682_v33 = vpop.f32.mrf.mxu0  ;;  %v1792_v61 = vpop.f32.mrf.mxu1 }
 0x1e1   : > { %v1793_v32 = vadd.f32 %v1792_v61, %v1678_v52  ;;  %v1949_v56 = vpop.f32.mrf.mxu2  ;;  %v2046_v54 = vpop.f32.mrf.mxu3  ;;  %v1683_v19 = vadd.f32 %v1682_v33, %v3723_v10 }
 0x1e3   : > { %v1950_v51 = vadd.f32 %v1949_v56, %v1793_v32 }
 0x1e5   : > { %v2047_v21 = vadd.f32 %v2046_v54, %v1950_v51 }
 0x1e7   : > { %2108 = vst [vmem:[%s3700_s26 + $0x18] sm:$0xff] %v2047_v21 }
 0x1e8   : > { %v1687_v26 = vpop.f32.mrf.mxu0  ;;  %v1798_v49 = vpop.f32.mrf.mxu1 }
 0x1e9   : > { %v1799_v9 = vadd.f32 %v1798_v49, %v1683_v19  ;;  %v1953_v24 = vpop.f32.mrf.mxu2  ;;  %v2050_v3 = vpop.f32.mrf.mxu3  ;;  %v1688_v14 = vadd.f32 %v1687_v26, %v3732_v38 }
 0x1eb   : > { %v1954_v16 = vadd.f32 %v1953_v24, %v1799_v9 }
 0x1ed   : > { %v2051_v55 = vadd.f32 %v2050_v3, %v1954_v16 }
 0x1ef   : > { %2110 = vst [vmem:[%s3700_s26 + $0x28] sm:$0xff] %v2051_v55 }
 0x1f0   : > { %v1692_v18 = vpop.f32.mrf.mxu0  ;;  %v1804_v7 = vpop.f32.mrf.mxu1 }
 0x1f1   : > { %v1805_v28 = vadd.f32 %v1804_v7, %v1688_v14  ;;  %v1957_v39 = vpop.f32.mrf.mxu2  ;;  %v2054_v13 = vpop.f32.mrf.mxu3  ;;  %v1693_v0 = vadd.f32 %v1692_v18, %v3741_v15 }
 0x1f3   : > { %v1958_v35 = vadd.f32 %v1957_v39, %v1805_v28 }
 0x1f5   : > { %v2055_v10 = vadd.f32 %v2054_v13, %v1958_v35 }
 0x1f7   : > { %2112 = vst [vmem:[%s3700_s26 + $0x38] sm:$0xff] %v2055_v10 }
 0x1f8   : > { %v1697_v1 = vpop.f32.mrf.mxu0  ;;  %v1810_v5 = vpop.f32.mrf.mxu1 }
 0x1f9   : > { %v1811_v47 = vadd.f32 %v1810_v5, %v1693_v0  ;;  %v1961_v48 = vpop.f32.mrf.mxu2  ;;  %v2058_v62 = vpop.f32.mrf.mxu3  ;;  %v1698_v34 = vadd.f32 %v1697_v1, %v3750_v45 }
 0x1fb   : > { %v1962_v36 = vadd.f32 %v1961_v48, %v1811_v47 }
 0x1fd   : > { %v2059_v38 = vadd.f32 %v2058_v62, %v1962_v36 }
 0x1ff   : > { %2114 = vst [vmem:[%s3700_s26 + $0x48] sm:$0xff] %v2059_v38 }
 0x200   : > { %v1702_v46 = vpop.f32.mrf.mxu0  ;;  %v1816_v27 = vpop.f32.mrf.mxu1 }
 0x201   : > { %v1817_v63 = vadd.f32 %v1816_v27, %v1698_v34  ;;  %v1965_v4 = vpop.f32.mrf.mxu2  ;;  %v2062_v41 = vpop.f32.mrf.mxu3  ;;  %v1703_v12 = vadd.f32 %v1702_v46, %v3759_v53 }
 0x203   : > { %v1966_v59 = vadd.f32 %v1965_v4, %v1817_v63 }
 0x205   : > { %v2063_v15 = vadd.f32 %v2062_v41, %v1966_v59 }
 0x207   : > { %2116 = vst [vmem:[%s3700_s26 + $0x58] sm:$0xff] %v2063_v15 }
 0x208   : > { %v1707_v8 = vpop.f32.mrf.mxu0  ;;  %v1822_v31 = vpop.f32.mrf.mxu1 }
 0x209   : > { %v1823_v58 = vadd.f32 %v1822_v31, %v1703_v12  ;;  %v1969_v57 = vpop.f32.mrf.mxu2  ;;  %v2066_v11 = vpop.f32.mrf.mxu3  ;;  %v1708_v44 = vadd.f32 %v1707_v8, %v3768_v20 }
 0x20b   : > { %v1970_v30 = vadd.f32 %v1969_v57, %v1823_v58 }
 0x20d   : > { %v2067_v45 = vadd.f32 %v2066_v11, %v1970_v30 }
 0x20f   : > { %2118 = vst [vmem:[%s3700_s26 + $0x68] sm:$0xff] %v2067_v45 }
 0x210   : > { %v1712_v6 = vpop.f32.mrf.mxu0  ;;  %v1828_v22 = vpop.f32.mrf.mxu1 }
 0x211   : > { %v1829_v17 = vadd.f32 %v1828_v22, %v1708_v44  ;;  %v1973_v60 = vpop.f32.mrf.mxu2  ;;  %v2070_v40 = vpop.f32.mrf.mxu3  ;;  %v1713_v33 = vadd.f32 %v1712_v6, %v3777_v50 }
 0x213   : > { %v1974_v52 = vadd.f32 %v1973_v60, %v1829_v17 }
 0x215   : > { %v2071_v53 = vadd.f32 %v2070_v40, %v1974_v52 }
 0x217   : > { %2120 = vst [vmem:[%s3700_s26 + $0x78] sm:$0xff] %v2071_v53 }
 0x218   : > { %v1717_v61 = vpop.f32.mrf.mxu0  ;;  %v1834_v32 = vpop.f32.mrf.mxu1 }
 0x219   : > { %v1835_v56 = vadd.f32 %v1834_v32, %v1713_v33  ;;  %v1977_v54 = vpop.f32.mrf.mxu2  ;;  %v2074_v51 = vpop.f32.mrf.mxu3  ;;  %v1718_v19 = vadd.f32 %v1717_v61, %v3786_v25 }
 0x21b   : > { %v1978_v21 = vadd.f32 %v1977_v54, %v1835_v56 }
 0x21d   : > { %v2075_v20 = vadd.f32 %v2074_v51, %v1978_v21 }
 0x21f   : > { %2122 = vst [vmem:[%s3700_s26 + $0x88] sm:$0xff] %v2075_v20 }
 0x220   : > { %v1722_v26 = vpop.f32.mrf.mxu0  ;;  %v1840_v49 = vpop.f32.mrf.mxu1 }
 0x221   : > { %v1841_v9 = vadd.f32 %v1840_v49, %v1718_v19  ;;  %v1981_v24 = vpop.f32.mrf.mxu2  ;;  %v2078_v3 = vpop.f32.mrf.mxu3  ;;  %v1723_v55 = vadd.f32 %v1722_v26, %v3795_v37 }
 0x223   : > { %v1982_v16 = vadd.f32 %v1981_v24, %v1841_v9 }
 0x225   : > { %v2079_v50 = vadd.f32 %v2078_v3, %v1982_v16 }
 0x227   : > { %2124 = vst [vmem:[%s3700_s26 + $0x98] sm:$0xff] %v2079_v50 }
 0x228   : > { %v1727_v14 = vpop.f32.mrf.mxu0  ;;  %v1846_v18 = vpop.f32.mrf.mxu1 }
 0x229   : > { %v1847_v7 = vadd.f32 %v1846_v18, %v1723_v55  ;;  %v1985_v28 = vpop.f32.mrf.mxu2  ;;  %v2082_v39 = vpop.f32.mrf.mxu3  ;;  %v1728_v35 = vadd.f32 %v1727_v14, %v3804_v29 }
 0x22b   : > { %v1986_v13 = vadd.f32 %v1985_v28, %v1847_v7 }
 0x22d   : > { %v2083_v25 = vadd.f32 %v2082_v39, %v1986_v13 }
 0x22f   : > { %2126 = vst [vmem:[%s3700_s26 + $0xa8] sm:$0xff] %v2083_v25 }
 0x230   : > { %v1732_v10 = vpop.f32.mrf.mxu0  ;;  %v1852_v0 = vpop.f32.mrf.mxu1 }
 0x231   : > { %v1853_v1 = vadd.f32 %v1852_v0, %v1728_v35  ;;  %v1989_v5 = vpop.f32.mrf.mxu2  ;;  %v2086_v47 = vpop.f32.mrf.mxu3  ;;  %v1733_v62 = vadd.f32 %v1732_v10, %v3813_v23 }
 0x233   : > { %v1990_v48 = vadd.f32 %v1989_v5, %v1853_v1 }
 0x235   : > { %v2087_v37 = vadd.f32 %v2086_v47, %v1990_v48 }
 0x237   : > { %2128 = vst [vmem:[%s3700_s26 + $0xb8] sm:$0xff] %v2087_v37 }
 0x238   : > { %v1737_v36 = vpop.f32.mrf.mxu0  ;;  %v1858_v38 = vpop.f32.mrf.mxu1 }
 0x239   : > { %v1859_v34 = vadd.f32 %v1858_v38, %v1733_v62  ;;  %v1993_v46 = vpop.f32.mrf.mxu2  ;;  %v2090_v27 = vpop.f32.mrf.mxu3  ;;  %v1738_v4 = vadd.f32 %v1737_v36, %v3822_v42 }
 0x23b   : > { %v1994_v63 = vadd.f32 %v1993_v46, %v1859_v34 }
 0x23d   : > { %v2091_v29 = vadd.f32 %v2090_v27, %v1994_v63 }
 0x23f   : > { %2130 = vst [vmem:[%s3700_s26 + $0xc8] sm:$0xff] %v2091_v29 }
 0x240   : > { %v1864_v41 = vpop.f32.mrf.mxu1  ;;  %v1742_v8 = vpop.f32.mrf.mxu0 }
 0x241   : > { %v1865_v59 = vadd.f32 %v1864_v41, %v1738_v4  ;;  %v1997_v15 = vpop.f32.mrf.mxu2  ;;  %v2094_v12 = vpop.f32.mrf.mxu3  ;;  %v1743_v58 = vadd.f32 %v1742_v8, %v3831_v2 }
 0x243   : > { %v1998_v23 = vadd.f32 %v1997_v15, %v1865_v59 }
 0x245   : > { %v2095_v31 = vadd.f32 %v2094_v12, %v1998_v23 }
 0x247   : > { %2132 = vst [vmem:[%s3700_s26 + $0xd8] sm:$0xff] %v2095_v31 }
 0x248   : > { %v1870_v57 = vpop.f32.mrf.mxu1  ;;  %v1747_v42 = vpop.f32.mrf.mxu0 }
 0x249   : > { %v1871_v11 = vadd.f32 %v1870_v57, %v1743_v58  ;;  %v2001_v30 = vpop.f32.mrf.mxu2  ;;  %v2098_v45 = vpop.f32.mrf.mxu3  ;;  %v1748_v22 = vadd.f32 %v1747_v42, %v3839_v43 }
 0x24b   : > { %v2002_v44 = vadd.f32 %v2001_v30, %v1871_v11 }
 0x24d   : > { %v2099_v6 = vadd.f32 %v2098_v45, %v2002_v44 }
 0x24f   : > { %2134 = vst [vmem:[%s3700_s26 + $0xe8] sm:$0xff] %v2099_v6 }
 0x250   : > { %v1876_v2 = vpop.f32.mrf.mxu1 }
 0x251   : > { %v1877_v17 = vadd.f32 %v1876_v2, %v1748_v22  ;;  %v2005_v60 = vpop.f32.mrf.mxu2  ;;  %v2102_v40 = vpop.f32.mrf.mxu3 }
 0x253   : > { %v2006_v52 = vadd.f32 %v2005_v60, %v1877_v17 }
 0x255   : > { %v2103_v53 = vadd.f32 %v2102_v40, %v2006_v52 }
 0x257   : > { %2136 = vst [vmem:[%s3700_s26 + $0xf8] sm:$0xff] %v2103_v53 }
 0x258   : > { %2452 = shalt.err (!%p2449_p13)
}
 0x259   : > { %s2516_s23 = smov 256   ;;  %s2517_s21 = smov 16  }
 0x25a   : > { %2294 = dma.vmem_to_hbm [thread:$0]  (%p2594_p9), %s2153_s25, 4096, %s2155_s11, %s2138_s18, %s2516_s23, %s2516_s23, %s2517_s21  }
 0x25b PF: > { %s2169_s22 = sand.u32 1, %s2491_s15   ;;  %p2304_p0 = pnand %p2271_p12, %p2601_p11 }
 0x25c   : > { %s2170_s24 = scalar_lea.sflag [#allocation4], %s2169_s22 }
 0x25d   : > { %p2305_p1 = pneg %p2304_p0 }
 0x25f   : > { %2486 = dma.done.wait (%p2305_p1), %s2170_s24, 4096  }
 0x260   : > { %2488 = vsyncadd (%p2305_p1), %s2170_s24, 4294963200  ;;  %s23_s20 = sadd.s32 1, %s2511_s20   ;;  %s4109_s28 = sld [smem:[#allocation11_spill]] }
 0x261   : > { %p20_p2 = scmp.ge.s32.totalorder %s23_s20, 4   ;;  %s4110_s15 = smov %s2495_s16 }
 0x262   : > { %s4111_s16 = smov %s2499_s17  ;;  %s4112_s17 = smov %s2599_s29 }
 0x263   : > { %s4113_s18 = smov %s2507_s19  ;;  %22 = sbr.rel (!%p20_p2) target bundleno = 10 (0xa), region = 94 }
 0x266   : > { %s4114_s19 = smov %s4109_s28 }
 0x268   :  { %2176 = vsyncpa [#allocation3], 1 }
 0x269   :  { %2178 = vsyncpa [#allocation3 + $0x1], 1 }
 0x26a   :  { %2179 = vsyncpa [#allocation6], 1 }
 0x26b   :  { %2181 = vsyncpa [#allocation6 + $0x1], 1 }
 0x26c   :  { %2182 = vsyncpa [#allocation4], 1 }
 0x26d   :  { %2184 = vsyncpa [#allocation4 + $0x1], 1 }

</bundles_post_ra>
